<compile_context>
chip_gen: v7x
topology: tpu7x:2x2x1
jax: 0.10.0
libtpu: 0.0.40
codegen_flags: <defaults>
</compile_context>

<pallas_src>
import functools

import jax
import jax.numpy as jnp
from jax import lax
from jax.experimental import pallas as pl
from jax.experimental.pallas import tpu as pltpu

EPS_LN = 1e-5
EPS_BN = 1e-5
MATMUL_DTYPE = jnp.bfloat16      # MXU input dtype; accumulation is always f32.
INTER_DTYPE = jnp.bfloat16       # stage-1 -> stage-2 HBM intermediate dtype.


def calc_same_padding(kernel_size):
    pad = kernel_size // 2
    return (pad, pad - (kernel_size + 1) % 2)


# ----------------------------------------------------------------------------
# Stage 1: LayerNorm -> pointwise conv #1 -> GLU -> depthwise "same" conv
#          + per-batch BatchNorm partial statistics.  Chunked along N.
# ----------------------------------------------------------------------------
def conv_stage1_kernel(K, pad_l, p0, chunk,
                       x_ref, lng_ref, lnb_ref,
                       w1a_ref, b1a_ref, w1b_ref, b1b_ref,
                       wdw_ref, bdw_ref,
                       dw_ref, sum_ref, ssq_ref,
                       pad_scr):
    N = x_ref.shape[0]
    I = pad_scr.shape[1]
    num_chunks = N // chunk
    pad_r = pad_scr.shape[0] - p0 - N

    # Zero ONLY the pad rows.  The body [p0, p0+N) is fully overwritten below.
    # Re-zeroed every grid step: with "parallel" batch sharding each core has its own
    # scratch and may never execute program_id 0, so a zero-once gate would be unsafe.
    if p0 > 0:
        pad_scr[pl.ds(0, p0), :] = jnp.zeros((p0, I), jnp.float32)
    if pad_r > 0:
        pad_scr[pl.ds(p0 + N, pad_r), :] = jnp.zeros((pad_r, I), jnp.float32)

    sum_ref[...] = jnp.zeros_like(sum_ref)
    ssq_ref[...] = jnp.zeros_like(ssq_ref)

    # Pass A: LayerNorm -> pointwise Conv1d(dim -> 2*inner, 1) -> GLU, streamed in row
    # chunks and written straight into the padded scratch at sublane-aligned offsets.
    @pl.loop(0, num_chunks)
    def _pass_a(c):
        row = pl.multiple_of(c * chunk, 8)
        x = x_ref[pl.ds(row, chunk), :]                               # (chunk, D) f32
        mu = jnp.mean(x, axis=-1, keepdims=True)
        var = jnp.mean((x - mu) ** 2, axis=-1, keepdims=True)
        xn = (x - mu) * lax.rsqrt(var + EPS_LN) * lng_ref[...] + lnb_ref[...]
        xn_mm = xn.astype(MATMUL_DTYPE)
        out_h = jnp.dot(xn_mm, w1a_ref[...],
                        preferred_element_type=jnp.float32) + b1a_ref[...]
        gate_h = jnp.dot(xn_mm, w1b_ref[...],
                         preferred_element_type=jnp.float32) + b1b_ref[...]
        pad_scr[pl.ds(p0 + row, chunk), :] = out_h * jax.nn.sigmoid(gate_h)

    # Pass B: depthwise "same" conv as K shifted MACs against the padded scratch,
    # plus per-batch BN partial statistics, chunk-wise.
    @pl.loop(0, num_chunks)
    def _pass_b(c):
        row = pl.multiple_of(c * chunk, 8)
        acc = jnp.zeros((chunk, I), jnp.float32)
        for k in range(K):                                            # static taps
            acc = acc + (pad_scr[pl.ds(p0 + row - pad_l + k, chunk), :]
                         * wdw_ref[pl.ds(k, 1), :])
        dw = acc + bdw_ref[...]                                       # (chunk, I) f32
        dw_ref[pl.ds(row, chunk), :] = dw.astype(dw_ref.dtype)        # bf16 writeback
        sum_ref[...] += jnp.sum(dw, axis=0, keepdims=True)            # f32 stats
        ssq_ref[...] += jnp.sum(dw * dw, axis=0, keepdims=True)


# ----------------------------------------------------------------------------
# Stage 2: folded BatchNorm affine -> Swish -> pointwise conv #2, over row tiles.
# ----------------------------------------------------------------------------
def conv_stage2_kernel(dw_ref, scale_ref, shift_ref, w2_ref, b2_ref, o_ref):
    dw = dw_ref[...].astype(jnp.float32)                              # (TM, I)
    bn = dw * scale_ref[...] + shift_ref[...]                         # BN (batch stats)
    s = bn * jax.nn.sigmoid(bn)                                       # Swish, f32
    o_ref[...] = jnp.dot(s.astype(MATMUL_DTYPE), w2_ref[...],
                         preferred_element_type=jnp.float32) + b2_ref[...]


# ----------------------------------------------------------------------------
# Wrappers
# ----------------------------------------------------------------------------
def _const_spec(a):
    zeros = (0,) * a.ndim
    return pl.BlockSpec(a.shape, lambda *_: zeros)


def _pick_chunk(n, target=256):
    """Largest multiple of 8 <= target that divides n; else the whole n."""
    if n <= target:
        return n
    c = (target // 8) * 8
    while c >= 8:
        if n % c == 0:
            return c
        c -= 8
    return n


def _vmem_limit_bytes(est):
    # 1.5x headroom, floor at the 32 MiB default, cap at v7x-safe 64 MiB.
    return int(min(64 * 2**20, max(32 * 2**20, int(est * 1.5))))


def conformer_conv_module(x, params, *, kernel_size):
    B, N, D = x.shape
    I = params["w1a"].shape[1]
    K = kernel_size
    pad_l, pad_r = calc_same_padding(K)
    p0 = ((pad_l + 7) // 8) * 8                    # aligned landing offset for g
    scr_rows = p0 + N + pad_r                      # covers all tap reads
    chunk = _pick_chunk(N)

    w1a = params["w1a"].astype(MATMUL_DTYPE)
    w1b = params["w1b"].astype(MATMUL_DTYPE)
    w2 = params["w2"].astype(MATMUL_DTYPE)

    # -------- stage 1: per-batch blocks (full N so the depthwise conv has its halo),
    # internally chunked along N to bound VMEM temporaries.
    est1 = (2 * N * D * 4 + 2 * N * I * 2 + 4 * I * 4
            + 4 * D * I * 2 + 2 * K * I * 4
            + scr_rows * I * 4 + 6 * chunk * I * 4)
    dw, psum, pssq = pl.pallas_call(
        functools.partial(conv_stage1_kernel, K, pad_l, p0, chunk),
        out_shape=(jax.ShapeDtypeStruct((B, N, I), INTER_DTYPE),
                   jax.ShapeDtypeStruct((B, 1, I), jnp.float32),
                   jax.ShapeDtypeStruct((B, 1, I), jnp.float32)),
        grid=(B,),
        in_specs=[pl.BlockSpec((None, N, D), lambda b: (b, 0, 0)),
                  _const_spec(params["ln_g"]), _const_spec(params["ln_b"]),
                  _const_spec(w1a), _const_spec(params["b1a"]),
                  _const_spec(w1b), _const_spec(params["b1b"]),
                  _const_spec(params["w_dw_t"]), _const_spec(params["b_dw"])],
        out_specs=(pl.BlockSpec((None, N, I), lambda b: (b, 0, 0)),
                   pl.BlockSpec((None, 1, I), lambda b: (b, 0, 0)),
                   pl.BlockSpec((None, 1, I), lambda b: (b, 0, 0))),
        scratch_shapes=[pltpu.VMEM((scr_rows, I), jnp.float32)],
        compiler_params=pltpu.CompilerParams(
            dimension_semantics=("parallel",),
            vmem_limit_bytes=_vmem_limit_bytes(est1)),
    )(x, params["ln_g"], params["ln_b"], w1a, params["b1a"], w1b, params["b1b"],
      params["w_dw_t"], params["b_dw"])

    # -------- fold BatchNorm (training-mode batch statistics, biased variance) into a
    # per-channel affine; O(B*I) scalars -> plain jnp glue between the two kernels.
    count = float(B * N)
    mean = jnp.sum(psum, axis=(0, 1)) / count                          # (I,)
    var = jnp.maximum(jnp.sum(pssq, axis=(0, 1)) / count - mean * mean, 0.0)
    inv = lax.rsqrt(var + EPS_BN)
    scale = params["bn_g"] * inv[None, :]                              # (1, I) f32
    shift = params["bn_b"] - mean[None, :] * scale                     # (1, I) f32

    # -------- stage 2: BN affine + Swish + pointwise conv #2 over (B*N)-row tiles.
    rows = B * N
    TM = rows if rows <= 1024 else 1024                 # 1024 is lane/sublane friendly
    dw2 = dw.reshape(rows, I)
    est2 = 2 * TM * I * 2 + 2 * TM * D * 4 + 2 * I * D * 2 + 8 * I * 4 + 2 * TM * I * 4
    y = pl.pallas_call(
        conv_stage2_kernel,
        out_shape=jax.ShapeDtypeStruct((rows, D), jnp.float32),
        grid=(pl.cdiv(rows, TM),),
        in_specs=[pl.BlockSpec((TM, I), lambda i: (i, 0)),
                  _const_spec(scale), _const_spec(shift),
                  _const_spec(w2), _const_spec(params["b2"])],
        out_specs=pl.BlockSpec((TM, D), lambda i: (i, 0)),
        compiler_params=pltpu.CompilerParams(
            dimension_semantics=("parallel",),
            vmem_limit_bytes=_vmem_limit_bytes(est2)),
    )(dw2, scale, shift, w2, params["b2"])

    # nn.Dropout(p=0.0) is the identity.
    return y.reshape(B, N, D)


# ----------------------------------------------------------------------------
# Deterministic synthetic parameters (PyTorch weights folded to matmul form)
# ----------------------------------------------------------------------------
def init_params(key, dim, expansion_factor, kernel_size):
    inner = dim * expansion_factor
    ks = jax.random.split(key, 8)
    std = 0.05

    def rnd(k, shape):
        return (jax.random.normal(k, shape) * std).astype(jnp.float32)

    return dict(
        ln_g=jnp.ones((1, dim), jnp.float32),
        ln_b=jnp.zeros((1, dim), jnp.float32),
        # Conv1d(dim, 2*inner, 1) weight (2I, D, 1) -> matmul (D, 2I), pre-split for GLU:
        w1a=rnd(ks[0], (dim, inner)), b1a=rnd(ks[1], (1, inner)),      # "out" half
        w1b=rnd(ks[2], (dim, inner)), b1b=rnd(ks[3], (1, inner)),      # "gate" half
        # Depthwise Conv1d(inner, inner, K, groups=inner) weight (I, 1, K) -> (K, I):
        w_dw_t=rnd(ks[4], (kernel_size, inner)), b_dw=rnd(ks[5], (1, inner)),
        bn_g=jnp.ones((1, inner), jnp.float32),
        bn_b=jnp.zeros((1, inner), jnp.float32),
        # Conv1d(inner, dim, 1) weight (D, I, 1) -> matmul (I, D):
        w2=rnd(ks[6], (inner, dim)), b2=rnd(ks[7], (1, dim)),
    )


if __name__ == "__main__":
    B, N, D = 2, 8, 32            # batch, sequence, model dim
    expansion_factor = 2          # inner = 64
    kernel_size = 31              # default Conformer depthwise kernel size

    key = jax.random.PRNGKey(0)
    kx, kp = jax.random.split(key)
    x = jax.random.normal(kx, (B, N, D), dtype=jnp.float32)
    params = init_params(kp, D, expansion_factor, kernel_size)

    fn = jax.jit(functools.partial(conformer_conv_module, kernel_size=kernel_size))
    out = fn(x, params)
    jax.block_until_ready(out)
    assert out.shape == (B, N, D) and out.dtype == jnp.float32
    assert bool(jnp.all(jnp.isfinite(out)))
    print("KERNEL_OK")
</pallas_src>

<mosaic_0001>
module attributes {stable_mosaic.version = 11 : i64} {
  func.func @conv_stage1_kernel(%arg0: i32, %arg1: memref<1x8x32xf32, #tpu.memory_space<vmem>>, %arg2: memref<1x32xf32, #tpu.memory_space<vmem>>, %arg3: memref<1x32xf32, #tpu.memory_space<vmem>>, %arg4: memref<32x64xbf16, #tpu.memory_space<vmem>>, %arg5: memref<1x64xf32, #tpu.memory_space<vmem>>, %arg6: memref<32x64xbf16, #tpu.memory_space<vmem>>, %arg7: memref<1x64xf32, #tpu.memory_space<vmem>>, %arg8: memref<31x64xf32, #tpu.memory_space<vmem>>, %arg9: memref<1x64xf32, #tpu.memory_space<vmem>>, %arg10: memref<1x8x64xbf16, #tpu.memory_space<vmem>>, %arg11: memref<1x1x64xf32, #tpu.memory_space<vmem>>, %arg12: memref<1x1x64xf32, #tpu.memory_space<vmem>>, %arg13: memref<39x64xf32, #tpu.memory_space<vmem>>) attributes {dimension_semantics = [#tpu.dimension_semantics<parallel>], iteration_bounds = array<i64: 2>, scalar_prefetch = 0 : i64, scratch_operands = 1 : i64, tpu.core_type = #tpu.core_type<tc>, window_params = [{transform_indices = @transform_0, window_bounds = array<i64: 1, 8, 32>}, {pipeline_mode = #tpu.pipeline_mode<synchronous>, transform_indices = @transform_1, window_bounds = array<i64: 1, 32>}, {pipeline_mode = #tpu.pipeline_mode<synchronous>, transform_indices = @transform_2, window_bounds = array<i64: 1, 32>}, {pipeline_mode = #tpu.pipeline_mode<synchronous>, transform_indices = @transform_3, window_bounds = array<i64: 32, 64>}, {pipeline_mode = #tpu.pipeline_mode<synchronous>, transform_indices = @transform_4, window_bounds = array<i64: 1, 64>}, {pipeline_mode = #tpu.pipeline_mode<synchronous>, transform_indices = @transform_5, window_bounds = array<i64: 32, 64>}, {pipeline_mode = #tpu.pipeline_mode<synchronous>, transform_indices = @transform_6, window_bounds = array<i64: 1, 64>}, {pipeline_mode = #tpu.pipeline_mode<synchronous>, transform_indices = @transform_7, window_bounds = array<i64: 31, 64>}, {pipeline_mode = #tpu.pipeline_mode<synchronous>, transform_indices = @transform_8, window_bounds = array<i64: 1, 64>}, {transform_indices = @transform_9, window_bounds = array<i64: 1, 8, 64>}, {transform_indices = @transform_10, window_bounds = array<i64: 1, 1, 64>}, {transform_indices = @transform_11, window_bounds = array<i64: 1, 1, 64>}]} {
    %cst = arith.constant 0.000000e+00 : f32
    %0 = vector.broadcast %cst : f32 to vector<16x64xf32>
    %c0 = arith.constant 0 : index
    %c0_0 = arith.constant 0 : index
    %1 = vector.load %arg13[%c0, %c0_0] : memref<39x64xf32, #tpu.memory_space<vmem>>, vector<16x64xf32>
    tpu.vector_store %arg13[%c0, %c0_0], %0 {strides = array<i32>} : memref<39x64xf32, #tpu.memory_space<vmem>>, vector<16x64xf32>,
    %cst_1 = arith.constant 0.000000e+00 : f32
    %2 = vector.broadcast %cst_1 : f32 to vector<15x64xf32>
    %c24 = arith.constant 24 : index
    %c0_2 = arith.constant 0 : index
    %3 = vector.load %arg13[%c24, %c0_2] : memref<39x64xf32, #tpu.memory_space<vmem>>, vector<15x64xf32>
    tpu.vector_store %arg13[%c24, %c0_2], %2 {strides = array<i32>} : memref<39x64xf32, #tpu.memory_space<vmem>>, vector<15x64xf32>,
    %cst_3 = arith.constant 0.000000e+00 : f32
    %4 = vector.broadcast %cst_3 : f32 to vector<1x64xf32>
    %c0_4 = arith.constant 0 : index
    %c0_5 = arith.constant 0 : index
    %c0_6 = arith.constant 0 : index
    %5 = vector.load %arg11[%c0_4, %c0_5, %c0_6] : memref<1x1x64xf32, #tpu.memory_space<vmem>>, vector<1x1x64xf32>
    %6 = vector.shape_cast %5 : vector<1x1x64xf32> to vector<1x64xf32>
    %7 = vector.shape_cast %4 : vector<1x64xf32> to vector<1x1x64xf32>
    tpu.vector_store %arg11[%c0_4, %c0_5, %c0_6], %7 {strides = array<i32>} : memref<1x1x64xf32, #tpu.memory_space<vmem>>, vector<1x1x64xf32>,
    %cst_7 = arith.constant 0.000000e+00 : f32
    %8 = vector.broadcast %cst_7 : f32 to vector<1x64xf32>
    %c0_8 = arith.constant 0 : index
    %c0_9 = arith.constant 0 : index
    %c0_10 = arith.constant 0 : index
    %9 = vector.load %arg12[%c0_8, %c0_9, %c0_10] : memref<1x1x64xf32, #tpu.memory_space<vmem>>, vector<1x1x64xf32>
    %10 = vector.shape_cast %9 : vector<1x1x64xf32> to vector<1x64xf32>
    %11 = vector.shape_cast %8 : vector<1x64xf32> to vector<1x1x64xf32>
    tpu.vector_store %arg12[%c0_8, %c0_9, %c0_10], %11 {strides = array<i32>} : memref<1x1x64xf32, #tpu.memory_space<vmem>>, vector<1x1x64xf32>,
    %c0_i32 = arith.constant 0 : i32
    %c1_i32 = arith.constant 1 : i32
    %12 = arith.muli %c0_i32, %c1_i32 : i32
    %c0_i32_11 = arith.constant 0 : i32
    %13 = arith.addi %c0_i32_11, %12 : i32
    %c8_i32 = arith.constant 8 : i32
    %14 = arith.muli %13, %c8_i32 : i32
    %15 = tpu.assume_multiple %14, 8 : i32
    %c0_12 = arith.constant 0 : index
    %16 = arith.index_cast %15 : i32 to index
    %c0_13 = arith.constant 0 : index
    %17 = vector.load %arg1[%c0_12, %16, %c0_13] : memref<1x8x32xf32, #tpu.memory_space<vmem>>, vector<1x8x32xf32>
    %18 = vector.shape_cast %17 : vector<1x8x32xf32> to vector<8x32xf32>
    %cst_14 = arith.constant dense<0.000000e+00> : vector<8xf32>
    %19 = vector.multi_reduction <add>, %18, %cst_14 [1] : vector<8x32xf32> to vector<8xf32>
    %20 = vector.shape_cast %19 : vector<8xf32> to vector<8x1xf32>
    %cst_15 = arith.constant 3.200000e+01 : f32
    %21 = vector.broadcast %cst_15 : f32 to vector<8x1xf32>
    %22 = arith.divf %20, %21 : vector<8x1xf32>
    %23 = vector.broadcast %22 : vector<8x1xf32> to vector<8x32xf32>
    %24 = arith.subf %18, %23 : vector<8x32xf32>
    %25 = arith.mulf %24, %24 : vector<8x32xf32>
    %cst_16 = arith.constant dense<0.000000e+00> : vector<8xf32>
    %26 = vector.multi_reduction <add>, %25, %cst_16 [1] : vector<8x32xf32> to vector<8xf32>
    %27 = vector.shape_cast %26 : vector<8xf32> to vector<8x1xf32>
    %cst_17 = arith.constant 3.200000e+01 : f32
    %28 = vector.broadcast %cst_17 : f32 to vector<8x1xf32>
    %29 = arith.divf %27, %28 : vector<8x1xf32>
    %30 = vector.broadcast %22 : vector<8x1xf32> to vector<8x32xf32>
    %31 = arith.subf %18, %30 : vector<8x32xf32>
    %cst_18 = arith.constant 9.99999974E-6 : f32
    %32 = vector.broadcast %cst_18 : f32 to vector<8x1xf32>
    %33 = arith.addf %29, %32 : vector<8x1xf32>
    %34 = math.rsqrt %33 : vector<8x1xf32>
    %35 = vector.broadcast %34 : vector<8x1xf32> to vector<8x32xf32>
    %36 = arith.mulf %31, %35 : vector<8x32xf32>
    %c0_19 = arith.constant 0 : index
    %c0_20 = arith.constant 0 : index
    %37 = vector.load %arg2[%c0_19, %c0_20] : memref<1x32xf32, #tpu.memory_space<vmem>>, vector<1x32xf32>
    %38 = vector.broadcast %37 : vector<1x32xf32> to vector<8x32xf32>
    %39 = arith.mulf %36, %38 : vector<8x32xf32>
    %c0_21 = arith.constant 0 : index
    %c0_22 = arith.constant 0 : index
    %40 = vector.load %arg3[%c0_21, %c0_22] : memref<1x32xf32, #tpu.memory_space<vmem>>, vector<1x32xf32>
    %41 = vector.broadcast %40 : vector<1x32xf32> to vector<8x32xf32>
    %42 = arith.addf %39, %41 : vector<8x32xf32>
    %43 = arith.truncf %42 : vector<8x32xf32> to vector<8x32xbf16>
    %c0_23 = arith.constant 0 : index
    %c0_24 = arith.constant 0 : index
    %44 = vector.load %arg4[%c0_23, %c0_24] : memref<32x64xbf16, #tpu.memory_space<vmem>>, vector<32x64xbf16>
    %cst_25 = arith.constant dense<0.000000e+00> : vector<8x64xf32>
    %45 = tpu.matmul %43, %44, %cst_25 {dimension_numbers = #tpu.dot_dimension_numbers<[1], [0], [0], [1], [0, 0, 1, 1], [], []>} : vector<8x32xbf16>, vector<32x64xbf16>, vector<8x64xf32> -> vector<8x64xf32>
    %c0_26 = arith.constant 0 : index
    %c0_27 = arith.constant 0 : index
    %46 = vector.load %arg5[%c0_26, %c0_27] : memref<1x64xf32, #tpu.memory_space<vmem>>, vector<1x64xf32>
    %47 = vector.broadcast %46 : vector<1x64xf32> to vector<8x64xf32>
    %48 = arith.addf %45, %47 : vector<8x64xf32>
    %c0_28 = arith.constant 0 : index
    %c0_29 = arith.constant 0 : index
    %49 = vector.load %arg6[%c0_28, %c0_29] : memref<32x64xbf16, #tpu.memory_space<vmem>>, vector<32x64xbf16>
    %cst_30 = arith.constant dense<0.000000e+00> : vector<8x64xf32>
    %50 = tpu.matmul %43, %49, %cst_30 {dimension_numbers = #tpu.dot_dimension_numbers<[1], [0], [0], [1], [0, 0, 1, 1], [], []>} : vector<8x32xbf16>, vector<32x64xbf16>, vector<8x64xf32> -> vector<8x64xf32>
    %c0_31 = arith.constant 0 : index
    %c0_32 = arith.constant 0 : index
    %51 = vector.load %arg7[%c0_31, %c0_32] : memref<1x64xf32, #tpu.memory_space<vmem>>, vector<1x64xf32>
    %52 = vector.broadcast %51 : vector<1x64xf32> to vector<8x64xf32>
    %53 = arith.addf %50, %52 : vector<8x64xf32>
    %54 = arith.negf %53 : vector<8x64xf32>
    %55 = math.exp %54 : vector<8x64xf32>
    %cst_33 = arith.constant 1.000000e+00 : f32
    %56 = vector.broadcast %cst_33 : f32 to vector<8x64xf32>
    %57 = arith.addf %56, %55 : vector<8x64xf32>
    %58 = arith.divf %56, %57 : vector<8x64xf32>
    %59 = arith.mulf %48, %58 : vector<8x64xf32>
    %c16_i32 = arith.constant 16 : i32
    %60 = arith.addi %c16_i32, %15 : i32
    %61 = arith.index_cast %60 : i32 to index
    %c0_34 = arith.constant 0 : index
    %62 = vector.load %arg13[%61, %c0_34] : memref<39x64xf32, #tpu.memory_space<vmem>>, vector<8x64xf32>
    tpu.vector_store %arg13[%61, %c0_34], %59 {strides = array<i32>} : memref<39x64xf32, #tpu.memory_space<vmem>>, vector<8x64xf32>,
    %c1_i32_35 = arith.constant 1 : i32
    %c0_i32_36 = arith.constant 0 : i32
    %c1_i32_37 = arith.constant 1 : i32
    %63 = arith.muli %c0_i32_36, %c1_i32_37 : i32
    %c0_i32_38 = arith.constant 0 : i32
    %64 = arith.addi %c0_i32_38, %63 : i32
    %c8_i32_39 = arith.constant 8 : i32
    %65 = arith.muli %64, %c8_i32_39 : i32
    %66 = tpu.assume_multiple %65, 8 : i32
    %cst_40 = arith.constant 0.000000e+00 : f32
    %67 = vector.broadcast %cst_40 : f32 to vector<8x64xf32>
    %c16_i32_41 = arith.constant 16 : i32
    %68 = arith.addi %c16_i32_41, %66 : i32
    %c15_i32 = arith.constant 15 : i32
    %69 = arith.subi %68, %c15_i32 : i32
    %c0_i32_42 = arith.constant 0 : i32
    %70 = arith.addi %69, %c0_i32_42 : i32
    %71 = arith.index_cast %70 : i32 to index
    %c0_43 = arith.constant 0 : index
    %72 = vector.load %arg13[%71, %c0_43] : memref<39x64xf32, #tpu.memory_space<vmem>>, vector<8x64xf32>
    %c0_44 = arith.constant 0 : index
    %c0_45 = arith.constant 0 : index
    %73 = vector.load %arg8[%c0_44, %c0_45] : memref<31x64xf32, #tpu.memory_space<vmem>>, vector<1x64xf32>
    %74 = vector.broadcast %73 : vector<1x64xf32> to vector<8x64xf32>
    %75 = arith.mulf %72, %74 : vector<8x64xf32>
    %76 = arith.addf %67, %75 : vector<8x64xf32>
    %c16_i32_46 = arith.constant 16 : i32
    %77 = arith.addi %c16_i32_46, %66 : i32
    %c15_i32_47 = arith.constant 15 : i32
    %78 = arith.subi %77, %c15_i32_47 : i32
    %c1_i32_48 = arith.constant 1 : i32
    %79 = arith.addi %78, %c1_i32_48 : i32
    %80 = arith.index_cast %79 : i32 to index
    %c0_49 = arith.constant 0 : index
    %81 = vector.load %arg13[%80, %c0_49] : memref<39x64xf32, #tpu.memory_space<vmem>>, vector<8x64xf32>
    %c1 = arith.constant 1 : index
    %c0_50 = arith.constant 0 : index
    %82 = vector.load %arg8[%c1, %c0_50] : memref<31x64xf32, #tpu.memory_space<vmem>>, vector<1x64xf32>
    %83 = vector.broadcast %82 : vector<1x64xf32> to vector<8x64xf32>
    %84 = arith.mulf %81, %83 : vector<8x64xf32>
    %85 = arith.addf %76, %84 : vector<8x64xf32>
    %c16_i32_51 = arith.constant 16 : i32
    %86 = arith.addi %c16_i32_51, %66 : i32
    %c15_i32_52 = arith.constant 15 : i32
    %87 = arith.subi %86, %c15_i32_52 : i32
    %c2_i32 = arith.constant 2 : i32
    %88 = arith.addi %87, %c2_i32 : i32
    %89 = arith.index_cast %88 : i32 to index
    %c0_53 = arith.constant 0 : index
    %90 = vector.load %arg13[%89, %c0_53] : memref<39x64xf32, #tpu.memory_space<vmem>>, vector<8x64xf32>
    %c2 = arith.constant 2 : index
    %c0_54 = arith.constant 0 : index
    %91 = vector.load %arg8[%c2, %c0_54] : memref<31x64xf32, #tpu.memory_space<vmem>>, vector<1x64xf32>
    %92 = vector.broadcast %91 : vector<1x64xf32> to vector<8x64xf32>
    %93 = arith.mulf %90, %92 : vector<8x64xf32>
    %94 = arith.addf %85, %93 : vector<8x64xf32>
    %c16_i32_55 = arith.constant 16 : i32
    %95 = arith.addi %c16_i32_55, %66 : i32
    %c15_i32_56 = arith.constant 15 : i32
    %96 = arith.subi %95, %c15_i32_56 : i32
    %c3_i32 = arith.constant 3 : i32
    %97 = arith.addi %96, %c3_i32 : i32
    %98 = arith.index_cast %97 : i32 to index
    %c0_57 = arith.constant 0 : index
    %99 = vector.load %arg13[%98, %c0_57] : memref<39x64xf32, #tpu.memory_space<vmem>>, vector<8x64xf32>
    %c3 = arith.constant 3 : index
    %c0_58 = arith.constant 0 : index
    %100 = vector.load %arg8[%c3, %c0_58] : memref<31x64xf32, #tpu.memory_space<vmem>>, vector<1x64xf32>
    %101 = vector.broadcast %100 : vector<1x64xf32> to vector<8x64xf32>
    %102 = arith.mulf %99, %101 : vector<8x64xf32>
    %103 = arith.addf %94, %102 : vector<8x64xf32>
    %c16_i32_59 = arith.constant 16 : i32
    %104 = arith.addi %c16_i32_59, %66 : i32
    %c15_i32_60 = arith.constant 15 : i32
    %105 = arith.subi %104, %c15_i32_60 : i32
    %c4_i32 = arith.constant 4 : i32
    %106 = arith.addi %105, %c4_i32 : i32
    %107 = arith.index_cast %106 : i32 to index
    %c0_61 = arith.constant 0 : index
    %108 = vector.load %arg13[%107, %c0_61] : memref<39x64xf32, #tpu.memory_space<vmem>>, vector<8x64xf32>
    %c4 = arith.constant 4 : index
    %c0_62 = arith.constant 0 : index
    %109 = vector.load %arg8[%c4, %c0_62] : memref<31x64xf32, #tpu.memory_space<vmem>>, vector<1x64xf32>
    %110 = vector.broadcast %109 : vector<1x64xf32> to vector<8x64xf32>
    %111 = arith.mulf %108, %110 : vector<8x64xf32>
    %112 = arith.addf %103, %111 : vector<8x64xf32>
    %c16_i32_63 = arith.constant 16 : i32
    %113 = arith.addi %c16_i32_63, %66 : i32
    %c15_i32_64 = arith.constant 15 : i32
    %114 = arith.subi %113, %c15_i32_64 : i32
    %c5_i32 = arith.constant 5 : i32
    %115 = arith.addi %114, %c5_i32 : i32
    %116 = arith.index_cast %115 : i32 to index
    %c0_65 = arith.constant 0 : index
    %117 = vector.load %arg13[%116, %c0_65] : memref<39x64xf32, #tpu.memory_space<vmem>>, vector<8x64xf32>
    %c5 = arith.constant 5 : index
    %c0_66 = arith.constant 0 : index
    %118 = vector.load %arg8[%c5, %c0_66] : memref<31x64xf32, #tpu.memory_space<vmem>>, vector<1x64xf32>
    %119 = vector.broadcast %118 : vector<1x64xf32> to vector<8x64xf32>
    %120 = arith.mulf %117, %119 : vector<8x64xf32>
    %121 = arith.addf %112, %120 : vector<8x64xf32>
    %c16_i32_67 = arith.constant 16 : i32
    %122 = arith.addi %c16_i32_67, %66 : i32
    %c15_i32_68 = arith.constant 15 : i32
    %123 = arith.subi %122, %c15_i32_68 : i32
    %c6_i32 = arith.constant 6 : i32
    %124 = arith.addi %123, %c6_i32 : i32
    %125 = arith.index_cast %124 : i32 to index
    %c0_69 = arith.constant 0 : index
    %126 = vector.load %arg13[%125, %c0_69] : memref<39x64xf32, #tpu.memory_space<vmem>>, vector<8x64xf32>
    %c6 = arith.constant 6 : index
    %c0_70 = arith.constant 0 : index
    %127 = vector.load %arg8[%c6, %c0_70] : memref<31x64xf32, #tpu.memory_space<vmem>>, vector<1x64xf32>
    %128 = vector.broadcast %127 : vector<1x64xf32> to vector<8x64xf32>
    %129 = arith.mulf %126, %128 : vector<8x64xf32>
    %130 = arith.addf %121, %129 : vector<8x64xf32>
    %c16_i32_71 = arith.constant 16 : i32
    %131 = arith.addi %c16_i32_71, %66 : i32
    %c15_i32_72 = arith.constant 15 : i32
    %132 = arith.subi %131, %c15_i32_72 : i32
    %c7_i32 = arith.constant 7 : i32
    %133 = arith.addi %132, %c7_i32 : i32
    %134 = arith.index_cast %133 : i32 to index
    %c0_73 = arith.constant 0 : index
    %135 = vector.load %arg13[%134, %c0_73] : memref<39x64xf32, #tpu.memory_space<vmem>>, vector<8x64xf32>
    %c7 = arith.constant 7 : index
    %c0_74 = arith.constant 0 : index
    %136 = vector.load %arg8[%c7, %c0_74] : memref<31x64xf32, #tpu.memory_space<vmem>>, vector<1x64xf32>
    %137 = vector.broadcast %136 : vector<1x64xf32> to vector<8x64xf32>
    %138 = arith.mulf %135, %137 : vector<8x64xf32>
    %139 = arith.addf %130, %138 : vector<8x64xf32>
    %c16_i32_75 = arith.constant 16 : i32
    %140 = arith.addi %c16_i32_75, %66 : i32
    %c15_i32_76 = arith.constant 15 : i32
    %141 = arith.subi %140, %c15_i32_76 : i32
    %c8_i32_77 = arith.constant 8 : i32
    %142 = arith.addi %141, %c8_i32_77 : i32
    %143 = arith.index_cast %142 : i32 to index
    %c0_78 = arith.constant 0 : index
    %144 = vector.load %arg13[%143, %c0_78] : memref<39x64xf32, #tpu.memory_space<vmem>>, vector<8x64xf32>
    %c8 = arith.constant 8 : index
    %c0_79 = arith.constant 0 : index
    %145 = vector.load %arg8[%c8, %c0_79] : memref<31x64xf32, #tpu.memory_space<vmem>>, vector<1x64xf32>
    %146 = vector.broadcast %145 : vector<1x64xf32> to vector<8x64xf32>
    %147 = arith.mulf %144, %146 : vector<8x64xf32>
    %148 = arith.addf %139, %147 : vector<8x64xf32>
    %c16_i32_80 = arith.constant 16 : i32
    %149 = arith.addi %c16_i32_80, %66 : i32
    %c15_i32_81 = arith.constant 15 : i32
    %150 = arith.subi %149, %c15_i32_81 : i32
    %c9_i32 = arith.constant 9 : i32
    %151 = arith.addi %150, %c9_i32 : i32
    %152 = arith.index_cast %151 : i32 to index
    %c0_82 = arith.constant 0 : index
    %153 = vector.load %arg13[%152, %c0_82] : memref<39x64xf32, #tpu.memory_space<vmem>>, vector<8x64xf32>
    %c9 = arith.constant 9 : index
    %c0_83 = arith.constant 0 : index
    %154 = vector.load %arg8[%c9, %c0_83] : memref<31x64xf32, #tpu.memory_space<vmem>>, vector<1x64xf32>
    %155 = vector.broadcast %154 : vector<1x64xf32> to vector<8x64xf32>
    %156 = arith.mulf %153, %155 : vector<8x64xf32>
    %157 = arith.addf %148, %156 : vector<8x64xf32>
    %c16_i32_84 = arith.constant 16 : i32
    %158 = arith.addi %c16_i32_84, %66 : i32
    %c15_i32_85 = arith.constant 15 : i32
    %159 = arith.subi %158, %c15_i32_85 : i32
    %c10_i32 = arith.constant 10 : i32
    %160 = arith.addi %159, %c10_i32 : i32
    %161 = arith.index_cast %160 : i32 to index
    %c0_86 = arith.constant 0 : index
    %162 = vector.load %arg13[%161, %c0_86] : memref<39x64xf32, #tpu.memory_space<vmem>>, vector<8x64xf32>
    %c10 = arith.constant 10 : index
    %c0_87 = arith.constant 0 : index
    %163 = vector.load %arg8[%c10, %c0_87] : memref<31x64xf32, #tpu.memory_space<vmem>>, vector<1x64xf32>
    %164 = vector.broadcast %163 : vector<1x64xf32> to vector<8x64xf32>
    %165 = arith.mulf %162, %164 : vector<8x64xf32>
    %166 = arith.addf %157, %165 : vector<8x64xf32>
    %c16_i32_88 = arith.constant 16 : i32
    %167 = arith.addi %c16_i32_88, %66 : i32
    %c15_i32_89 = arith.constant 15 : i32
    %168 = arith.subi %167, %c15_i32_89 : i32
    %c11_i32 = arith.constant 11 : i32
    %169 = arith.addi %168, %c11_i32 : i32
    %170 = arith.index_cast %169 : i32 to index
    %c0_90 = arith.constant 0 : index
    %171 = vector.load %arg13[%170, %c0_90] : memref<39x64xf32, #tpu.memory_space<vmem>>, vector<8x64xf32>
    %c11 = arith.constant 11 : index
    %c0_91 = arith.constant 0 : index
    %172 = vector.load %arg8[%c11, %c0_91] : memref<31x64xf32, #tpu.memory_space<vmem>>, vector<1x64xf32>
    %173 = vector.broadcast %172 : vector<1x64xf32> to vector<8x64xf32>
    %174 = arith.mulf %171, %173 : vector<8x64xf32>
    %175 = arith.addf %166, %174 : vector<8x64xf32>
    %c16_i32_92 = arith.constant 16 : i32
    %176 = arith.addi %c16_i32_92, %66 : i32
    %c15_i32_93 = arith.constant 15 : i32
    %177 = arith.subi %176, %c15_i32_93 : i32
    %c12_i32 = arith.constant 12 : i32
    %178 = arith.addi %177, %c12_i32 : i32
    %179 = arith.index_cast %178 : i32 to index
    %c0_94 = arith.constant 0 : index
    %180 = vector.load %arg13[%179, %c0_94] : memref<39x64xf32, #tpu.memory_space<vmem>>, vector<8x64xf32>
    %c12 = arith.constant 12 : index
    %c0_95 = arith.constant 0 : index
    %181 = vector.load %arg8[%c12, %c0_95] : memref<31x64xf32, #tpu.memory_space<vmem>>, vector<1x64xf32>
    %182 = vector.broadcast %181 : vector<1x64xf32> to vector<8x64xf32>
    %183 = arith.mulf %180, %182 : vector<8x64xf32>
    %184 = arith.addf %175, %183 : vector<8x64xf32>
    %c16_i32_96 = arith.constant 16 : i32
    %185 = arith.addi %c16_i32_96, %66 : i32
    %c15_i32_97 = arith.constant 15 : i32
    %186 = arith.subi %185, %c15_i32_97 : i32
    %c13_i32 = arith.constant 13 : i32
    %187 = arith.addi %186, %c13_i32 : i32
    %188 = arith.index_cast %187 : i32 to index
    %c0_98 = arith.constant 0 : index
    %189 = vector.load %arg13[%188, %c0_98] : memref<39x64xf32, #tpu.memory_space<vmem>>, vector<8x64xf32>
    %c13 = arith.constant 13 : index
    %c0_99 = arith.constant 0 : index
    %190 = vector.load %arg8[%c13, %c0_99] : memref<31x64xf32, #tpu.memory_space<vmem>>, vector<1x64xf32>
    %191 = vector.broadcast %190 : vector<1x64xf32> to vector<8x64xf32>
    %192 = arith.mulf %189, %191 : vector<8x64xf32>
    %193 = arith.addf %184, %192 : vector<8x64xf32>
    %c16_i32_100 = arith.constant 16 : i32
    %194 = arith.addi %c16_i32_100, %66 : i32
    %c15_i32_101 = arith.constant 15 : i32
    %195 = arith.subi %194, %c15_i32_101 : i32
    %c14_i32 = arith.constant 14 : i32
    %196 = arith.addi %195, %c14_i32 : i32
    %197 = arith.index_cast %196 : i32 to index
    %c0_102 = arith.constant 0 : index
    %198 = vector.load %arg13[%197, %c0_102] : memref<39x64xf32, #tpu.memory_space<vmem>>, vector<8x64xf32>
    %c14 = arith.constant 14 : index
    %c0_103 = arith.constant 0 : index
    %199 = vector.load %arg8[%c14, %c0_103] : memref<31x64xf32, #tpu.memory_space<vmem>>, vector<1x64xf32>
    %200 = vector.broadcast %199 : vector<1x64xf32> to vector<8x64xf32>
    %201 = arith.mulf %198, %200 : vector<8x64xf32>
    %202 = arith.addf %193, %201 : vector<8x64xf32>
    %c16_i32_104 = arith.constant 16 : i32
    %203 = arith.addi %c16_i32_104, %66 : i32
    %c15_i32_105 = arith.constant 15 : i32
    %204 = arith.subi %203, %c15_i32_105 : i32
    %c15_i32_106 = arith.constant 15 : i32
    %205 = arith.addi %204, %c15_i32_106 : i32
    %206 = arith.index_cast %205 : i32 to index
    %c0_107 = arith.constant 0 : index
    %207 = vector.load %arg13[%206, %c0_107] : memref<39x64xf32, #tpu.memory_space<vmem>>, vector<8x64xf32>
    %c15 = arith.constant 15 : index
    %c0_108 = arith.constant 0 : index
    %208 = vector.load %arg8[%c15, %c0_108] : memref<31x64xf32, #tpu.memory_space<vmem>>, vector<1x64xf32>
    %209 = vector.broadcast %208 : vector<1x64xf32> to vector<8x64xf32>
    %210 = arith.mulf %207, %209 : vector<8x64xf32>
    %211 = arith.addf %202, %210 : vector<8x64xf32>
    %c16_i32_109 = arith.constant 16 : i32
    %212 = arith.addi %c16_i32_109, %66 : i32
    %c15_i32_110 = arith.constant 15 : i32
    %213 = arith.subi %212, %c15_i32_110 : i32
    %c16_i32_111 = arith.constant 16 : i32
    %214 = arith.addi %213, %c16_i32_111 : i32
    %215 = arith.index_cast %214 : i32 to index
    %c0_112 = arith.constant 0 : index
    %216 = vector.load %arg13[%215, %c0_112] : memref<39x64xf32, #tpu.memory_space<vmem>>, vector<8x64xf32>
    %c16 = arith.constant 16 : index
    %c0_113 = arith.constant 0 : index
    %217 = vector.load %arg8[%c16, %c0_113] : memref<31x64xf32, #tpu.memory_space<vmem>>, vector<1x64xf32>
    %218 = vector.broadcast %217 : vector<1x64xf32> to vector<8x64xf32>
    %219 = arith.mulf %216, %218 : vector<8x64xf32>
    %220 = arith.addf %211, %219 : vector<8x64xf32>
    %c16_i32_114 = arith.constant 16 : i32
    %221 = arith.addi %c16_i32_114, %66 : i32
    %c15_i32_115 = arith.constant 15 : i32
    %222 = arith.subi %221, %c15_i32_115 : i32
    %c17_i32 = arith.constant 17 : i32
    %223 = arith.addi %222, %c17_i32 : i32
    %224 = arith.index_cast %223 : i32 to index
    %c0_116 = arith.constant 0 : index
    %225 = vector.load %arg13[%224, %c0_116] : memref<39x64xf32, #tpu.memory_space<vmem>>, vector<8x64xf32>
    %c17 = arith.constant 17 : index
    %c0_117 = arith.constant 0 : index
    %226 = vector.load %arg8[%c17, %c0_117] : memref<31x64xf32, #tpu.memory_space<vmem>>, vector<1x64xf32>
    %227 = vector.broadcast %226 : vector<1x64xf32> to vector<8x64xf32>
    %228 = arith.mulf %225, %227 : vector<8x64xf32>
    %229 = arith.addf %220, %228 : vector<8x64xf32>
    %c16_i32_118 = arith.constant 16 : i32
    %230 = arith.addi %c16_i32_118, %66 : i32
    %c15_i32_119 = arith.constant 15 : i32
    %231 = arith.subi %230, %c15_i32_119 : i32
    %c18_i32 = arith.constant 18 : i32
    %232 = arith.addi %231, %c18_i32 : i32
    %233 = arith.index_cast %232 : i32 to index
    %c0_120 = arith.constant 0 : index
    %234 = vector.load %arg13[%233, %c0_120] : memref<39x64xf32, #tpu.memory_space<vmem>>, vector<8x64xf32>
    %c18 = arith.constant 18 : index
    %c0_121 = arith.constant 0 : index
    %235 = vector.load %arg8[%c18, %c0_121] : memref<31x64xf32, #tpu.memory_space<vmem>>, vector<1x64xf32>
    %236 = vector.broadcast %235 : vector<1x64xf32> to vector<8x64xf32>
    %237 = arith.mulf %234, %236 : vector<8x64xf32>
    %238 = arith.addf %229, %237 : vector<8x64xf32>
    %c16_i32_122 = arith.constant 16 : i32
    %239 = arith.addi %c16_i32_122, %66 : i32
    %c15_i32_123 = arith.constant 15 : i32
    %240 = arith.subi %239, %c15_i32_123 : i32
    %c19_i32 = arith.constant 19 : i32
    %241 = arith.addi %240, %c19_i32 : i32
    %242 = arith.index_cast %241 : i32 to index
    %c0_124 = arith.constant 0 : index
    %243 = vector.load %arg13[%242, %c0_124] : memref<39x64xf32, #tpu.memory_space<vmem>>, vector<8x64xf32>
    %c19 = arith.constant 19 : index
    %c0_125 = arith.constant 0 : index
    %244 = vector.load %arg8[%c19, %c0_125] : memref<31x64xf32, #tpu.memory_space<vmem>>, vector<1x64xf32>
    %245 = vector.broadcast %244 : vector<1x64xf32> to vector<8x64xf32>
    %246 = arith.mulf %243, %245 : vector<8x64xf32>
    %247 = arith.addf %238, %246 : vector<8x64xf32>
    %c16_i32_126 = arith.constant 16 : i32
    %248 = arith.addi %c16_i32_126, %66 : i32
    %c15_i32_127 = arith.constant 15 : i32
    %249 = arith.subi %248, %c15_i32_127 : i32
    %c20_i32 = arith.constant 20 : i32
    %250 = arith.addi %249, %c20_i32 : i32
    %251 = arith.index_cast %250 : i32 to index
    %c0_128 = arith.constant 0 : index
    %252 = vector.load %arg13[%251, %c0_128] : memref<39x64xf32, #tpu.memory_space<vmem>>, vector<8x64xf32>
    %c20 = arith.constant 20 : index
    %c0_129 = arith.constant 0 : index
    %253 = vector.load %arg8[%c20, %c0_129] : memref<31x64xf32, #tpu.memory_space<vmem>>, vector<1x64xf32>
    %254 = vector.broadcast %253 : vector<1x64xf32> to vector<8x64xf32>
    %255 = arith.mulf %252, %254 : vector<8x64xf32>
    %256 = arith.addf %247, %255 : vector<8x64xf32>
    %c16_i32_130 = arith.constant 16 : i32
    %257 = arith.addi %c16_i32_130, %66 : i32
    %c15_i32_131 = arith.constant 15 : i32
    %258 = arith.subi %257, %c15_i32_131 : i32
    %c21_i32 = arith.constant 21 : i32
    %259 = arith.addi %258, %c21_i32 : i32
    %260 = arith.index_cast %259 : i32 to index
    %c0_132 = arith.constant 0 : index
    %261 = vector.load %arg13[%260, %c0_132] : memref<39x64xf32, #tpu.memory_space<vmem>>, vector<8x64xf32>
    %c21 = arith.constant 21 : index
    %c0_133 = arith.constant 0 : index
    %262 = vector.load %arg8[%c21, %c0_133] : memref<31x64xf32, #tpu.memory_space<vmem>>, vector<1x64xf32>
    %263 = vector.broadcast %262 : vector<1x64xf32> to vector<8x64xf32>
    %264 = arith.mulf %261, %263 : vector<8x64xf32>
    %265 = arith.addf %256, %264 : vector<8x64xf32>
    %c16_i32_134 = arith.constant 16 : i32
    %266 = arith.addi %c16_i32_134, %66 : i32
    %c15_i32_135 = arith.constant 15 : i32
    %267 = arith.subi %266, %c15_i32_135 : i32
    %c22_i32 = arith.constant 22 : i32
    %268 = arith.addi %267, %c22_i32 : i32
    %269 = arith.index_cast %268 : i32 to index
    %c0_136 = arith.constant 0 : index
    %270 = vector.load %arg13[%269, %c0_136] : memref<39x64xf32, #tpu.memory_space<vmem>>, vector<8x64xf32>
    %c22 = arith.constant 22 : index
    %c0_137 = arith.constant 0 : index
    %271 = vector.load %arg8[%c22, %c0_137] : memref<31x64xf32, #tpu.memory_space<vmem>>, vector<1x64xf32>
    %272 = vector.broadcast %271 : vector<1x64xf32> to vector<8x64xf32>
    %273 = arith.mulf %270, %272 : vector<8x64xf32>
    %274 = arith.addf %265, %273 : vector<8x64xf32>
    %c16_i32_138 = arith.constant 16 : i32
    %275 = arith.addi %c16_i32_138, %66 : i32
    %c15_i32_139 = arith.constant 15 : i32
    %276 = arith.subi %275, %c15_i32_139 : i32
    %c23_i32 = arith.constant 23 : i32
    %277 = arith.addi %276, %c23_i32 : i32
    %278 = arith.index_cast %277 : i32 to index
    %c0_140 = arith.constant 0 : index
    %279 = vector.load %arg13[%278, %c0_140] : memref<39x64xf32, #tpu.memory_space<vmem>>, vector<8x64xf32>
    %c23 = arith.constant 23 : index
    %c0_141 = arith.constant 0 : index
    %280 = vector.load %arg8[%c23, %c0_141] : memref<31x64xf32, #tpu.memory_space<vmem>>, vector<1x64xf32>
    %281 = vector.broadcast %280 : vector<1x64xf32> to vector<8x64xf32>
    %282 = arith.mulf %279, %281 : vector<8x64xf32>
    %283 = arith.addf %274, %282 : vector<8x64xf32>
    %c16_i32_142 = arith.constant 16 : i32
    %284 = arith.addi %c16_i32_142, %66 : i32
    %c15_i32_143 = arith.constant 15 : i32
    %285 = arith.subi %284, %c15_i32_143 : i32
    %c24_i32 = arith.constant 24 : i32
    %286 = arith.addi %285, %c24_i32 : i32
    %287 = arith.index_cast %286 : i32 to index
    %c0_144 = arith.constant 0 : index
    %288 = vector.load %arg13[%287, %c0_144] : memref<39x64xf32, #tpu.memory_space<vmem>>, vector<8x64xf32>
    %c24_145 = arith.constant 24 : index
    %c0_146 = arith.constant 0 : index
    %289 = vector.load %arg8[%c24_145, %c0_146] : memref<31x64xf32, #tpu.memory_space<vmem>>, vector<1x64xf32>
    %290 = vector.broadcast %289 : vector<1x64xf32> to vector<8x64xf32>
    %291 = arith.mulf %288, %290 : vector<8x64xf32>
    %292 = arith.addf %283, %291 : vector<8x64xf32>
    %c16_i32_147 = arith.constant 16 : i32
    %293 = arith.addi %c16_i32_147, %66 : i32
    %c15_i32_148 = arith.constant 15 : i32
    %294 = arith.subi %293, %c15_i32_148 : i32
    %c25_i32 = arith.constant 25 : i32
    %295 = arith.addi %294, %c25_i32 : i32
    %296 = arith.index_cast %295 : i32 to index
    %c0_149 = arith.constant 0 : index
    %297 = vector.load %arg13[%296, %c0_149] : memref<39x64xf32, #tpu.memory_space<vmem>>, vector<8x64xf32>
    %c25 = arith.constant 25 : index
    %c0_150 = arith.constant 0 : index
    %298 = vector.load %arg8[%c25, %c0_150] : memref<31x64xf32, #tpu.memory_space<vmem>>, vector<1x64xf32>
    %299 = vector.broadcast %298 : vector<1x64xf32> to vector<8x64xf32>
    %300 = arith.mulf %297, %299 : vector<8x64xf32>
    %301 = arith.addf %292, %300 : vector<8x64xf32>
    %c16_i32_151 = arith.constant 16 : i32
    %302 = arith.addi %c16_i32_151, %66 : i32
    %c15_i32_152 = arith.constant 15 : i32
    %303 = arith.subi %302, %c15_i32_152 : i32
    %c26_i32 = arith.constant 26 : i32
    %304 = arith.addi %303, %c26_i32 : i32
    %305 = arith.index_cast %304 : i32 to index
    %c0_153 = arith.constant 0 : index
    %306 = vector.load %arg13[%305, %c0_153] : memref<39x64xf32, #tpu.memory_space<vmem>>, vector<8x64xf32>
    %c26 = arith.constant 26 : index
    %c0_154 = arith.constant 0 : index
    %307 = vector.load %arg8[%c26, %c0_154] : memref<31x64xf32, #tpu.memory_space<vmem>>, vector<1x64xf32>
    %308 = vector.broadcast %307 : vector<1x64xf32> to vector<8x64xf32>
    %309 = arith.mulf %306, %308 : vector<8x64xf32>
    %310 = arith.addf %301, %309 : vector<8x64xf32>
    %c16_i32_155 = arith.constant 16 : i32
    %311 = arith.addi %c16_i32_155, %66 : i32
    %c15_i32_156 = arith.constant 15 : i32
    %312 = arith.subi %311, %c15_i32_156 : i32
    %c27_i32 = arith.constant 27 : i32
    %313 = arith.addi %312, %c27_i32 : i32
    %314 = arith.index_cast %313 : i32 to index
    %c0_157 = arith.constant 0 : index
    %315 = vector.load %arg13[%314, %c0_157] : memref<39x64xf32, #tpu.memory_space<vmem>>, vector<8x64xf32>
    %c27 = arith.constant 27 : index
    %c0_158 = arith.constant 0 : index
    %316 = vector.load %arg8[%c27, %c0_158] : memref<31x64xf32, #tpu.memory_space<vmem>>, vector<1x64xf32>
    %317 = vector.broadcast %316 : vector<1x64xf32> to vector<8x64xf32>
    %318 = arith.mulf %315, %317 : vector<8x64xf32>
    %319 = arith.addf %310, %318 : vector<8x64xf32>
    %c16_i32_159 = arith.constant 16 : i32
    %320 = arith.addi %c16_i32_159, %66 : i32
    %c15_i32_160 = arith.constant 15 : i32
    %321 = arith.subi %320, %c15_i32_160 : i32
    %c28_i32 = arith.constant 28 : i32
    %322 = arith.addi %321, %c28_i32 : i32
    %323 = arith.index_cast %322 : i32 to index
    %c0_161 = arith.constant 0 : index
    %324 = vector.load %arg13[%323, %c0_161] : memref<39x64xf32, #tpu.memory_space<vmem>>, vector<8x64xf32>
    %c28 = arith.constant 28 : index
    %c0_162 = arith.constant 0 : index
    %325 = vector.load %arg8[%c28, %c0_162] : memref<31x64xf32, #tpu.memory_space<vmem>>, vector<1x64xf32>
    %326 = vector.broadcast %325 : vector<1x64xf32> to vector<8x64xf32>
    %327 = arith.mulf %324, %326 : vector<8x64xf32>
    %328 = arith.addf %319, %327 : vector<8x64xf32>
    %c16_i32_163 = arith.constant 16 : i32
    %329 = arith.addi %c16_i32_163, %66 : i32
    %c15_i32_164 = arith.constant 15 : i32
    %330 = arith.subi %329, %c15_i32_164 : i32
    %c29_i32 = arith.constant 29 : i32
    %331 = arith.addi %330, %c29_i32 : i32
    %332 = arith.index_cast %331 : i32 to index
    %c0_165 = arith.constant 0 : index
    %333 = vector.load %arg13[%332, %c0_165] : memref<39x64xf32, #tpu.memory_space<vmem>>, vector<8x64xf32>
    %c29 = arith.constant 29 : index
    %c0_166 = arith.constant 0 : index
    %334 = vector.load %arg8[%c29, %c0_166] : memref<31x64xf32, #tpu.memory_space<vmem>>, vector<1x64xf32>
    %335 = vector.broadcast %334 : vector<1x64xf32> to vector<8x64xf32>
    %336 = arith.mulf %333, %335 : vector<8x64xf32>
    %337 = arith.addf %328, %336 : vector<8x64xf32>
    %c16_i32_167 = arith.constant 16 : i32
    %338 = arith.addi %c16_i32_167, %66 : i32
    %c15_i32_168 = arith.constant 15 : i32
    %339 = arith.subi %338, %c15_i32_168 : i32
    %c30_i32 = arith.constant 30 : i32
    %340 = arith.addi %339, %c30_i32 : i32
    %341 = arith.index_cast %340 : i32 to index
    %c0_169 = arith.constant 0 : index
    %342 = vector.load %arg13[%341, %c0_169] : memref<39x64xf32, #tpu.memory_space<vmem>>, vector<8x64xf32>
    %c30 = arith.constant 30 : index
    %c0_170 = arith.constant 0 : index
    %343 = vector.load %arg8[%c30, %c0_170] : memref<31x64xf32, #tpu.memory_space<vmem>>, vector<1x64xf32>
    %344 = vector.broadcast %343 : vector<1x64xf32> to vector<8x64xf32>
    %345 = arith.mulf %342, %344 : vector<8x64xf32>
    %346 = arith.addf %337, %345 : vector<8x64xf32>
    %c0_171 = arith.constant 0 : index
    %c0_172 = arith.constant 0 : index
    %347 = vector.load %arg9[%c0_171, %c0_172] : memref<1x64xf32, #tpu.memory_space<vmem>>, vector<1x64xf32>
    %348 = vector.broadcast %347 : vector<1x64xf32> to vector<8x64xf32>
    %349 = arith.addf %346, %348 : vector<8x64xf32>
    %350 = arith.truncf %349 : vector<8x64xf32> to vector<8x64xbf16>
    %c0_173 = arith.constant 0 : index
    %351 = arith.index_cast %66 : i32 to index
    %c0_174 = arith.constant 0 : index
    %352 = vector.load %arg10[%c0_173, %351, %c0_174] : memref<1x8x64xbf16, #tpu.memory_space<vmem>>, vector<1x8x64xbf16>
    %353 = vector.shape_cast %352 : vector<1x8x64xbf16> to vector<8x64xbf16>
    %354 = vector.shape_cast %350 : vector<8x64xbf16> to vector<1x8x64xbf16>
    tpu.vector_store %arg10[%c0_173, %351, %c0_174], %354 {strides = array<i32>} : memref<1x8x64xbf16, #tpu.memory_space<vmem>>, vector<1x8x64xbf16>,
    %c0_175 = arith.constant 0 : index
    %c0_176 = arith.constant 0 : index
    %c0_177 = arith.constant 0 : index
    %355 = vector.load %arg11[%c0_175, %c0_176, %c0_177] : memref<1x1x64xf32, #tpu.memory_space<vmem>>, vector<1x1x64xf32>
    %356 = vector.shape_cast %355 : vector<1x1x64xf32> to vector<1x64xf32>
    %cst_178 = arith.constant dense<0.000000e+00> : vector<64xf32>
    %357 = vector.multi_reduction <add>, %349, %cst_178 [0] : vector<8x64xf32> to vector<64xf32>
    %358 = vector.shape_cast %357 : vector<64xf32> to vector<1x64xf32>
    %359 = arith.addf %356, %358 : vector<1x64xf32>
    %c0_179 = arith.constant 0 : index
    %c0_180 = arith.constant 0 : index
    %c0_181 = arith.constant 0 : index
    %360 = vector.load %arg11[%c0_179, %c0_180, %c0_181] : memref<1x1x64xf32, #tpu.memory_space<vmem>>, vector<1x1x64xf32>
    %361 = vector.shape_cast %360 : vector<1x1x64xf32> to vector<1x64xf32>
    %362 = vector.shape_cast %359 : vector<1x64xf32> to vector<1x1x64xf32>
    tpu.vector_store %arg11[%c0_179, %c0_180, %c0_181], %362 {strides = array<i32>} : memref<1x1x64xf32, #tpu.memory_space<vmem>>, vector<1x1x64xf32>,
    %c0_182 = arith.constant 0 : index
    %c0_183 = arith.constant 0 : index
    %c0_184 = arith.constant 0 : index
    %363 = vector.load %arg12[%c0_182, %c0_183, %c0_184] : memref<1x1x64xf32, #tpu.memory_space<vmem>>, vector<1x1x64xf32>
    %364 = vector.shape_cast %363 : vector<1x1x64xf32> to vector<1x64xf32>
    %365 = arith.mulf %349, %349 : vector<8x64xf32>
    %cst_185 = arith.constant dense<0.000000e+00> : vector<64xf32>
    %366 = vector.multi_reduction <add>, %365, %cst_185 [0] : vector<8x64xf32> to vector<64xf32>
    %367 = vector.shape_cast %366 : vector<64xf32> to vector<1x64xf32>
    %368 = arith.addf %364, %367 : vector<1x64xf32>
    %c0_186 = arith.constant 0 : index
    %c0_187 = arith.constant 0 : index
    %c0_188 = arith.constant 0 : index
    %369 = vector.load %arg12[%c0_186, %c0_187, %c0_188] : memref<1x1x64xf32, #tpu.memory_space<vmem>>, vector<1x1x64xf32>
    %370 = vector.shape_cast %369 : vector<1x1x64xf32> to vector<1x64xf32>
    %371 = vector.shape_cast %368 : vector<1x64xf32> to vector<1x1x64xf32>
    tpu.vector_store %arg12[%c0_186, %c0_187, %c0_188], %371 {strides = array<i32>} : memref<1x1x64xf32, #tpu.memory_space<vmem>>, vector<1x1x64xf32>,
    %c1_i32_189 = arith.constant 1 : i32
    return
  }
  func.func @transform_0(%arg0: i32) -> (i32, i32, i32) {
    %c0_i32 = arith.constant 0 : i32
    %c0_i32_0 = arith.constant 0 : i32
    %c0_i32_1 = arith.constant 0 : i32
    return %arg0, %c0_i32, %c0_i32_0 : i32, i32, i32
  }
  func.func @transform_1(%arg0: i32) -> (i32, i32) {
    %c0_i32 = arith.constant 0 : i32
    %c0_i32_0 = arith.constant 0 : i32
    %c0_i32_1 = arith.constant 0 : i32
    return %c0_i32, %c0_i32_0 : i32, i32
  }
  func.func @transform_2(%arg0: i32) -> (i32, i32) {
    %c0_i32 = arith.constant 0 : i32
    %c0_i32_0 = arith.constant 0 : i32
    %c0_i32_1 = arith.constant 0 : i32
    return %c0_i32, %c0_i32_0 : i32, i32
  }
  func.func @transform_3(%arg0: i32) -> (i32, i32) {
    %c0_i32 = arith.constant 0 : i32
    %c0_i32_0 = arith.constant 0 : i32
    %c0_i32_1 = arith.constant 0 : i32
    return %c0_i32, %c0_i32_0 : i32, i32
  }
  func.func @transform_4(%arg0: i32) -> (i32, i32) {
    %c0_i32 = arith.constant 0 : i32
    %c0_i32_0 = arith.constant 0 : i32
    %c0_i32_1 = arith.constant 0 : i32
    return %c0_i32, %c0_i32_0 : i32, i32
  }
  func.func @transform_5(%arg0: i32) -> (i32, i32) {
    %c0_i32 = arith.constant 0 : i32
    %c0_i32_0 = arith.constant 0 : i32
    %c0_i32_1 = arith.constant 0 : i32
    return %c0_i32, %c0_i32_0 : i32, i32
  }
  func.func @transform_6(%arg0: i32) -> (i32, i32) {
    %c0_i32 = arith.constant 0 : i32
    %c0_i32_0 = arith.constant 0 : i32
    %c0_i32_1 = arith.constant 0 : i32
    return %c0_i32, %c0_i32_0 : i32, i32
  }
  func.func @transform_7(%arg0: i32) -> (i32, i32) {
    %c0_i32 = arith.constant 0 : i32
    %c0_i32_0 = arith.constant 0 : i32
    %c0_i32_1 = arith.constant 0 : i32
    return %c0_i32, %c0_i32_0 : i32, i32
  }
  func.func @transform_8(%arg0: i32) -> (i32, i32) {
    %c0_i32 = arith.constant 0 : i32
    %c0_i32_0 = arith.constant 0 : i32
    %c0_i32_1 = arith.constant 0 : i32
    return %c0_i32, %c0_i32_0 : i32, i32
  }
  func.func @transform_9(%arg0: i32) -> (i32, i32, i32) {
    %c0_i32 = arith.constant 0 : i32
    %c0_i32_0 = arith.constant 0 : i32
    %c0_i32_1 = arith.constant 0 : i32
    return %arg0, %c0_i32, %c0_i32_0 : i32, i32, i32
  }
  func.func @transform_10(%arg0: i32) -> (i32, i32, i32) {
    %c0_i32 = arith.constant 0 : i32
    %c0_i32_0 = arith.constant 0 : i32
    %c0_i32_1 = arith.constant 0 : i32
    return %arg0, %c0_i32, %c0_i32_0 : i32, i32, i32
  }
  func.func @transform_11(%arg0: i32) -> (i32, i32, i32) {
    %c0_i32 = arith.constant 0 : i32
    %c0_i32_0 = arith.constant 0 : i32
    %c0_i32_1 = arith.constant 0 : i32
    return %arg0, %c0_i32, %c0_i32_0 : i32, i32, i32
  }
}

module attributes {stable_mosaic.version = 11 : i64} {
  func.func @conv_stage2_kernel(%arg0: i32, %arg1: memref<16x64xbf16, #tpu.memory_space<vmem>>, %arg2: memref<1x64xf32, #tpu.memory_space<vmem>>, %arg3: memref<1x64xf32, #tpu.memory_space<vmem>>, %arg4: memref<64x32xbf16, #tpu.memory_space<vmem>>, %arg5: memref<1x32xf32, #tpu.memory_space<vmem>>, %arg6: memref<16x32xf32, #tpu.memory_space<vmem>>) attributes {dimension_semantics = [#tpu.dimension_semantics<parallel>], iteration_bounds = array<i64: 1>, scalar_prefetch = 0 : i64, scratch_operands = 0 : i64, tpu.core_type = #tpu.core_type<tc>, window_params = [{transform_indices = @transform_0, window_bounds = array<i64: 16, 64>}, {pipeline_mode = #tpu.pipeline_mode<synchronous>, transform_indices = @transform_1, window_bounds = array<i64: 1, 64>}, {pipeline_mode = #tpu.pipeline_mode<synchronous>, transform_indices = @transform_2, window_bounds = array<i64: 1, 64>}, {pipeline_mode = #tpu.pipeline_mode<synchronous>, transform_indices = @transform_3, window_bounds = array<i64: 64, 32>}, {pipeline_mode = #tpu.pipeline_mode<synchronous>, transform_indices = @transform_4, window_bounds = array<i64: 1, 32>}, {transform_indices = @transform_5, window_bounds = array<i64: 16, 32>}]} {
    %c0 = arith.constant 0 : index
    %c0_0 = arith.constant 0 : index
    %0 = vector.load %arg1[%c0, %c0_0] : memref<16x64xbf16, #tpu.memory_space<vmem>>, vector<16x64xbf16>
    %1 = arith.extf %0 : vector<16x64xbf16> to vector<16x64xf32>
    %c0_1 = arith.constant 0 : index
    %c0_2 = arith.constant 0 : index
    %2 = vector.load %arg2[%c0_1, %c0_2] : memref<1x64xf32, #tpu.memory_space<vmem>>, vector<1x64xf32>
    %3 = vector.broadcast %2 : vector<1x64xf32> to vector<16x64xf32>
    %4 = arith.mulf %1, %3 : vector<16x64xf32>
    %c0_3 = arith.constant 0 : index
    %c0_4 = arith.constant 0 : index
    %5 = vector.load %arg3[%c0_3, %c0_4] : memref<1x64xf32, #tpu.memory_space<vmem>>, vector<1x64xf32>
    %6 = vector.broadcast %5 : vector<1x64xf32> to vector<16x64xf32>
    %7 = arith.addf %4, %6 : vector<16x64xf32>
    %8 = arith.negf %7 : vector<16x64xf32>
    %9 = math.exp %8 : vector<16x64xf32>
    %cst = arith.constant 1.000000e+00 : f32
    %10 = vector.broadcast %cst : f32 to vector<16x64xf32>
    %11 = arith.addf %10, %9 : vector<16x64xf32>
    %12 = arith.divf %10, %11 : vector<16x64xf32>
    %13 = arith.mulf %7, %12 : vector<16x64xf32>
    %14 = arith.truncf %13 : vector<16x64xf32> to vector<16x64xbf16>
    %c0_5 = arith.constant 0 : index
    %c0_6 = arith.constant 0 : index
    %15 = vector.load %arg4[%c0_5, %c0_6] : memref<64x32xbf16, #tpu.memory_space<vmem>>, vector<64x32xbf16>
    %cst_7 = arith.constant dense<0.000000e+00> : vector<16x32xf32>
    %16 = tpu.matmul %14, %15, %cst_7 {dimension_numbers = #tpu.dot_dimension_numbers<[1], [0], [0], [1], [0, 0, 1, 1], [], []>} : vector<16x64xbf16>, vector<64x32xbf16>, vector<16x32xf32> -> vector<16x32xf32>
    %c0_8 = arith.constant 0 : index
    %c0_9 = arith.constant 0 : index
    %17 = vector.load %arg5[%c0_8, %c0_9] : memref<1x32xf32, #tpu.memory_space<vmem>>, vector<1x32xf32>
    %18 = vector.broadcast %17 : vector<1x32xf32> to vector<16x32xf32>
    %19 = arith.addf %16, %18 : vector<16x32xf32>
    %c0_10 = arith.constant 0 : index
    %c0_11 = arith.constant 0 : index
    %20 = vector.load %arg6[%c0_10, %c0_11] : memref<16x32xf32, #tpu.memory_space<vmem>>, vector<16x32xf32>
    tpu.vector_store %arg6[%c0_10, %c0_11], %19 {strides = array<i32>} : memref<16x32xf32, #tpu.memory_space<vmem>>, vector<16x32xf32>,
    return
  }
  func.func @transform_0(%arg0: i32) -> (i32, i32) {
    %c0_i32 = arith.constant 0 : i32
    %c0_i32_0 = arith.constant 0 : i32
    return %arg0, %c0_i32 : i32, i32
  }
  func.func @transform_1(%arg0: i32) -> (i32, i32) {
    %c0_i32 = arith.constant 0 : i32
    %c0_i32_0 = arith.constant 0 : i32
    %c0_i32_1 = arith.constant 0 : i32
    return %c0_i32, %c0_i32_0 : i32, i32
  }
  func.func @transform_2(%arg0: i32) -> (i32, i32) {
    %c0_i32 = arith.constant 0 : i32
    %c0_i32_0 = arith.constant 0 : i32
    %c0_i32_1 = arith.constant 0 : i32
    return %c0_i32, %c0_i32_0 : i32, i32
  }
  func.func @transform_3(%arg0: i32) -> (i32, i32) {
    %c0_i32 = arith.constant 0 : i32
    %c0_i32_0 = arith.constant 0 : i32
    %c0_i32_1 = arith.constant 0 : i32
    return %c0_i32, %c0_i32_0 : i32, i32
  }
  func.func @transform_4(%arg0: i32) -> (i32, i32) {
    %c0_i32 = arith.constant 0 : i32
    %c0_i32_0 = arith.constant 0 : i32
    %c0_i32_1 = arith.constant 0 : i32
    return %c0_i32, %c0_i32_0 : i32, i32
  }
  func.func @transform_5(%arg0: i32) -> (i32, i32) {
    %c0_i32 = arith.constant 0 : i32
    %c0_i32_0 = arith.constant 0 : i32
    return %arg0, %c0_i32 : i32, i32
  }
}

</mosaic_0001>

<bundles_post_ra>
// kernel: conformer_conv_module.3
= control target key start
LH: loop header
LB: loop body
LE: loop exit
PB: predicated region body
PF: predicated region fallthrough
CT: control target
= control target key end

     0   :  { %v234_v1 = vmov 0.0   ;;  %vm235_vm0 = vmmov 0   ;;  %s305_s0 = inlined_call_operand.vmem [shape: bf16[16,64], index: 0, kind: input, shape index: {}]   ;;  %s306_s1 = inlined_call_operand.vmem [shape: f32[1,64], index: 1, kind: input, shape index: {}]   ;;  %s307_s2 = inlined_call_operand.vmem [shape: f32[1,64], index: 2, kind: input, shape index: {}]   ;;  %s308_s3 = inlined_call_operand.vmem [shape: bf16[64,32], index: 3, kind: input, shape index: {}]   ;;  %s309_s4 = inlined_call_operand.vmem [shape: f32[1,32], index: 4, kind: input, shape index: {}]   ;;  %s310_s5 = inlined_call_operand.hbm [shape: f32[16,32], index: 5, kind: output, shape index: {}]  }
   0x1   :  { %v198_v0 = vld [vmem:[%s308_s3] sm:$0xff]   ;;  %181 = vmatprep.subr.bf16.mxu0 %v234_v1  ;;  %v199_v2 = vld [vmem:[%s308_s3 + $0x8] sm:$0xff]   ;;  %189 = vmatprep.mubr.msk.bf16.mxu0 %vm235_vm0, %v234_v1 }
   0x2   :  { %182 = vmatpush3.bf16.msra.mxu0 %v198_v0  ;;  %v173_v3 = vld [vmem:[%s305_s0] sm:$0xff]  }
   0x3   :  { %183 = vmatprep.subr.bf16.mxu0 %v234_v1  ;;  %v162_v4 = vld [vmem:[%s306_s1] ss:$0 sm:$0xff]  ;;  %v174_v5 = vunpack.c.l.bf16 %v173_v3  ;;  %v175_v6 = vunpack.c.h.bf16 %v173_v3 }
   0x4   :  { %10 = vsyncpa [#allocation3], 0  ;;  %v200_v7 = vld [vmem:[%s308_s3 + $0x10] sm:$0xff]   ;;  %v163_v8 = vld [vmem:[%s307_s2] ss:$0 sm:$0xff]  ;;  %vm98_vm1 = vcmask 523264  }
   0x5   :  { %v33_v9 = vmul.f32 %v174_v5, %v162_v4  ;;  %v34_v10 = vmul.f32 %v175_v6, %v162_v4  ;;  %v201_v13 = vld [vmem:[%s308_s3 + $0x18] sm:$0xff]   ;;  %v166_v25 = vld [vmem:[%s309_s4] ss:$0 sm:$0xff]  ;;  %s236_s30 = smov [#allocation2]   ;;  %vm143_vm2 = vcmask 261120  }
   0x6   :  { %184 = vmatpush3.bf16.msra.mxu0 %v199_v2  ;;  %s151_s6 = sshll.u32 %s236_s30, 4  ;;  %s152_s6 = int_to_ptr.vmem [resolvable:$true] %s151_s6 }
   0x7   :  { %185 = vmatprep.subr.bf16.mxu0 %v234_v1  ;;  %v42_v11 = vadd.f32 %v163_v8, %v33_v9  ;;  %v43_v12 = vadd.f32 %v163_v8, %v34_v10  ;;  %s210_s7 = scalar_lea.vmem %s152_s6, 256  ;;  %p215_p1 = scmp.lt.s32.totalorder %s152_s6, %s152_s6 }
   0x8   :  { %p211_p0 = scmp.ne.s32.totalorder %s152_s6, %s210_s7  ;;  %p216_p2 = scmp.lt.s32.totalorder %s210_s7, %s210_s7 }
   0x9   :  { %v164_v14 = vmul.f32 -1.442695, %v42_v11  ;;  %v165_v15 = vmul.f32 -1.442695, %v43_v12 }
   0xa   :  { %186 = vmatpush3.bf16.msra.mxu0 %v200_v7  ;;  %p217_p3 = por %p216_p2, %p215_p1 }
   0xb   :  { %187 = vmatprep.subr.bf16.mxu0 %v234_v1  ;;  %202 = vpow2.f32 %v164_v14 }
   0xc   :  { %204 = vpow2.f32 %v165_v15  ;;  %p218_p4 = pnand %p217_p3, %p211_p0 }
   0xe   :  { %188 = vmatpush3.bf16.msra.mxu0 %v201_v13 }
  0x15   :  { %v203_v16 = vpop.eup %202 }
  0x16   :  { %v205_v17 = vpop.eup %204  ;;  %v50_v18 = vadd.f32 1.0, %v203_v16 }
  0x17   :  { %v51_v19 = vadd.f32 1.0, %v205_v17 }
  0x18   :  { %206 = vrcp.f32 %v50_v18 }
  0x19   :  { %208 = vrcp.f32 %v51_v19 }
  0x22   :  { %v207_v20 = vpop.eup %206 }
  0x23   :  { %v209_v21 = vpop.eup %208  ;;  %v56_v22 = vmul.f32 %v207_v20, %v42_v11 }
  0x24   :  { %v57_v23 = vmul.f32 %v209_v21, %v43_v12 }
  0x26   :  { %v58_v24 = vpack.c.bf16 %v57_v23, %v56_v22 }
  0x28   :  { %190 = vmatmul.mubr.msk.bf16.vlgmr.msra.gmra.mrb[0].mxu0 %vm98_vm1, %v58_v24 }
  0xfb   :  { %v136_v26 = vpop.f32.mrb[0].mxu0 }
  0xfc   :  { %v137_v27 = vadd.f32 %v166_v25, %v136_v26  ;;  %v191_v28 = vpop.f32.mrb[1].mxu0 }
  0xfd   :  { %v139_v29 = vpop.f32.mrb[2].mxu0 }
  0xfe   :  { %144 = vst.msk [vmem:[#allocation2] sm:$0xff] %vm143_vm2, %v137_v27  ;;  %v140_v30 = vadd.f32 %v166_v25, %v139_v29  ;;  %v192_v31 = vpop.f32.mrb[3].mxu0 }
 0x100   :  { %145 = vst.msk [vmem:[#allocation2 + $0x8] sm:$0xff] %vm143_vm2, %v140_v30 }
 0x101   :  { %221 = shalt.err (!%p218_p4)
}
 0x102   :  { %s222_s9 = scalar_lea.hbm %s310_s5, 256 }
 0x103   :  { %p223_p5 = scmp.ne.s32.totalorder %s310_s5, %s222_s9  ;;  %p226_p6 = scmp.lt.u32.totalorder %s222_s9, %s310_s5 }
 0x105   :  { %p228_p7 = pnand %p226_p6, %p223_p5 }
 0x107   :  { %231 = shalt.err (!%p228_p7)
}
 0x108   :  { %s237_s14 = smov 128   ;;  %s238_s15 = smov 8  }
 0x109   :  { %157 = dma.vmem_to_hbm [thread:$0]  %s152_s6, 256, %s310_s5, [#allocation3], %s237_s14, %s237_s14, %s238_s15  }
 0x10a   :  { %232 = dma.done.wait [#allocation3], 256  }
 0x10b   :  { %233 = vsyncadd [#allocation3], 4294967040 }
 0x10c   :  { %161 = vsyncpa [#allocation3], 1 }

// kernel: conformer_conv_module.2
= control target key start
LH: loop header
LB: loop body
LE: loop exit
PB: predicated region body
PF: predicated region fallthrough
CT: control target
= control target key end

     0   :  { %s1219_s17 = smov 0   ;;  %s1392_s0 = inlined_call_operand.vmem [shape: f32[2,8,32], index: 0, kind: input, shape index: {}]   ;;  %s1393_s1 = inlined_call_operand.vmem [shape: f32[1,32], index: 1, kind: input, shape index: {}]   ;;  %s1394_s2 = inlined_call_operand.vmem [shape: f32[1,32], index: 2, kind: input, shape index: {}]   ;;  %s1395_s3 = inlined_call_operand.vmem [shape: bf16[32,64], index: 3, kind: input, shape index: {}]   ;;  %s1396_s4 = inlined_call_operand.vmem [shape: f32[1,64], index: 4, kind: input, shape index: {}]   ;;  %s1397_s5 = inlined_call_operand.vmem [shape: bf16[32,64], index: 5, kind: input, shape index: {}]   ;;  %s1398_s6 = inlined_call_operand.vmem [shape: f32[1,64], index: 6, kind: input, shape index: {}]   ;;  %s1399_s7 = inlined_call_operand.vmem [shape: f32[31,64], index: 7, kind: input, shape index: {}]   ;;  %s1400_s8 = inlined_call_operand.vmem [shape: f32[1,64], index: 8, kind: input, shape index: {}]   ;;  %s1401_s9 = inlined_call_operand.vmem [shape: bf16[2,8,64], index: 9, kind: output, shape index: {0}]   ;;  %s1402_s10 = inlined_call_operand.vmem [shape: f32[2,1,64], index: 10, kind: output, shape index: {1}]   ;;  %s1403_s11 = inlined_call_operand.vmem [shape: f32[2,1,64], index: 11, kind: output, shape index: {2}]  }
   0x1 LB: > { %s1055_s18 = sadd.s32 4294967295, %s1155_s17   ;;  %p1059_p0 = scmp.ge.s32.totalorder %s1155_s17, 1  ;;  %s1155_s17 = sphi %s1219_s17, %s22_s17  }
   0x2   : > { %p341_p1 = scmp.lt.s32.totalorder %s1155_s17, 3 }
   0x4   : > { %p342_p2 = pnand %p1059_p0, %p341_p1 }
   0x5   : > { %p385_p3 = scmp.lt.s32.totalorder (!%p342_p2), %s1055_s18, 1  ;;  %v1157_v0 = vmov (!%p342_p2), 0.0   ;;  %vm406_vm0 = vcmask (!%p342_p2), 516096   ;;  %vm410_vm1 = vcmask (!%p342_p2), 261120   ;;  %v1139_v8 = vld [vmem:[%s1395_s3] sm:$0xff] (!%p342_p2)   ;;  %v1141_v10 = vld [vmem:[%s1395_s3 + $0x8] sm:$0xff] (!%p342_p2)  }
   0x6   : > { %345 = sbr.rel (%p342_p2) target bundleno = 650 (0x28a), region = 56  ;;  %1113 = vmatprep.subr.bf16.mxu0 (!%p342_p2), %v1157_v0  ;;  %1121 = vmatprep.subr.bf16.mxu1 (!%p342_p2), %v1157_v0  ;;  %v1140_v9 = vld [vmem:[%s1397_s5] sm:$0xff] (!%p342_p2)   ;;  %v1142_v11 = vld [vmem:[%s1397_s5 + $0x8] sm:$0xff] (!%p342_p2)   ;;  %vm1158_vm2 = vmmov (!%p342_p2), 0   ;;  %vm400_vm3 = vcmask (!%p342_p2), 523264   ;;  %vm404_vm4 = vcmask (!%p342_p2), 522240  }
   0x7   : > { %1114 = vmatpush3.bf16.msra.mxu0 (!%p342_p2), %v1139_v8  ;;  %1122 = vmatpush3.bf16.msra.mxu1 (!%p342_p2), %v1140_v9  ;;  %v1062_v16 = vld [vmem:[%s1393_s1] ss:$0 sm:$0xff] (!%p342_p2)  ;;  %401 = vst.msk [vmem:[#allocation2] sm:$0xff] (!%p342_p2), %vm400_vm3, %v1157_v0  ;;  %402 = vst.msk [vmem:[#allocation2 + $0x8] sm:$0xff] (!%p342_p2), %vm400_vm3, %v1157_v0  ;;  %v1074_v36 = vld [vmem:[%s1399_s7 + $0x1] ss:$0 sm:$0xff] (!%p342_p2) }
   0x8   : > { %1115 = vmatprep.subr.bf16.mxu0 (!%p342_p2), %v1157_v0  ;;  %1123 = vmatprep.subr.bf16.mxu1 (!%p342_p2), %v1157_v0  ;;  %v1063_v18 = vld [vmem:[%s1394_s2] ss:$0 sm:$0xff] (!%p342_p2)  ;;  %403 = vst.msk [vmem:[#allocation2 + $0x18] sm:$0xff] (!%p342_p2), %vm400_vm3, %v1157_v0  ;;  %v1075_v40 = vld [vmem:[%s1399_s7 + $0x2] ss:$0 sm:$0xff] (!%p342_p2)  ;;  %vm898_vm5 = vcmask (!%p342_p2), 519168  }
   0x9   : > { %1117 = vmatprep.mubr.msk.bf16.mxu0 (!%p342_p2), %vm1158_vm2, %v1157_v0  ;;  %1125 = vmatprep.mubr.msk.bf16.mxu1 (!%p342_p2), %vm1158_vm2, %v1157_v0  ;;  %405 = vst.msk [vmem:[#allocation2 + $0x20] sm:$0x7f] (!%p342_p2), %vm404_vm4, %v1157_v0  ;;  %v1068_v22 = vld [vmem:[%s1398_s6] ss:$0 sm:$0xff] (!%p342_p2)  ;;  %v1076_v44 = vld [vmem:[%s1399_s7 + $0x3] ss:$0 sm:$0xff] (!%p342_p2) }
   0xa   : > { %v1073_v34 = vld [vmem:[%s1399_s7] ss:$0 sm:$0xff] (!%p342_p2)  ;;  %v1077_v50 = vld [vmem:[%s1399_s7 + $0x4] ss:$0 sm:$0xff] (!%p342_p2)  ;;  %v1078_v54 = vld [vmem:[%s1399_s7 + $0x5] ss:$0 sm:$0xff] (!%p342_p2) }
   0xb   : > { %1116 = vmatpush3.bf16.msra.mxu0 (!%p342_p2), %v1141_v10  ;;  %1124 = vmatpush3.bf16.msra.mxu1 (!%p342_p2), %v1142_v11  ;;  %v1064_v55 = vld [vmem:[%s1396_s4] ss:$0 sm:$0xff] (!%p342_p2)  ;;  %v1079_v59 = vld [vmem:[%s1399_s7 + $0x6] ss:$0 sm:$0xff] (!%p342_p2)  ;;  %v1082_v9 = vld [vmem:[%s1399_s7 + $0x9] ss:$0 sm:$0xff] (!%p342_p2) }
   0xd   : > { %s1405_s18 = smov (!%p385_p3, %s1055_s18), 1 }
   0xe   : > { %s1060_s19 = sshll.u32 %s1405_s18, 3  ;;  %s1237_s25 = scalar_lea.vmem %s1402_s10, %s1405_s18  ;;  %v583_v33 = vld [vmem:[#allocation2 + $0x1] sm:$0xff] }
   0xf   : > { %s388_s22 = scalar_lea.vmem %s1392_s0, %s1060_s19  ;;  %s1243_s28 = scalar_lea.vmem %s1403_s11, %s1405_s18  ;;  %407 = vst.msk [vmem:[%s1237_s25] sm:$0x1] %vm406_vm0, %v1157_v0  ;;  %v593_v35 = vld [vmem:[#allocation2 + $0x2] sm:$0xff]  ;;  %v589_v37 = vmul.f32 %v1073_v34, %v583_v33 }
  0x10   : > { %v409_v1 = vld [vmem:[%s388_s22] sm:$0xff]  ;;  %408 = vst.msk [vmem:[%s1243_s28] sm:$0x1] %vm406_vm0, %v1157_v0  ;;  %v599_v38 = vmul.f32 %v1074_v36, %v593_v35  ;;  %v1089_v36 = vld [vmem:[%s1399_s7 + $0x10] ss:$0 sm:$0xff]  ;;  %s1061_s15 = sshll.u32 %s1405_s18, 2 }
  0x11   : > { %v411_v2 = vsel %vm410_vm1, %v409_v1, 0.0  ;;  %v603_v39 = vld [vmem:[#allocation2 + $0x3] sm:$0xff]  ;;  %s392_s20 = scalar_lea.vmem %s1401_s9, %s1061_s15 }
  0x12   : > { %412 = vadd.xlane.f32.xlu0 %v411_v2  ;;  %v600_v41 = vadd.f32 %v599_v38, %v589_v37  ;;  %v609_v42 = vmul.f32 %v1075_v40, %v603_v39  ;;  %v613_v43 = vld [vmem:[#allocation2 + $0x4] sm:$0xff]  ;;  %v1090_v40 = vld [vmem:[%s1399_s7 + $0x11] ss:$0 sm:$0xff] }
  0x13   : > { %v619_v48 = vmul.f32 %v1076_v44, %v613_v43  ;;  %v623_v49 = vld [vmem:[#allocation2 + $0x5] sm:$0xff]  ;;  %v1091_v44 = vld [vmem:[%s1399_s7 + $0x12] ss:$0 sm:$0xff] }
  0x14   : > { %v610_v47 = vadd.f32 %v609_v42, %v600_v41  ;;  %v629_v52 = vmul.f32 %v1077_v50, %v623_v49  ;;  %v633_v53 = vld [vmem:[#allocation2 + $0x6] sm:$0xff] }
  0x15   : > { %v639_v57 = vmul.f32 %v1078_v54, %v633_v53  ;;  %v643_v58 = vld [vmem:[#allocation2 + $0x7] sm:$0xff] }
  0x16   : > { %v620_v51 = vadd.f32 %v619_v48, %v610_v47  ;;  %v649_v0 = vmul.f32 %v1079_v59, %v643_v58  ;;  %v1080_v2 = vld [vmem:[%s1399_s7 + $0x7] ss:$0 sm:$0xff]  ;;  %v1092_v48 = vld [vmem:[%s1399_s7 + $0x13] ss:$0 sm:$0xff]  ;;  %v1095_v59 = vld [vmem:[%s1399_s7 + $0x16] ss:$0 sm:$0xff] }
  0x18   : > { %v630_v56 = vadd.f32 %v629_v52, %v620_v51  ;;  %v1093_v52 = vld [vmem:[%s1399_s7 + $0x14] ss:$0 sm:$0xff] }
  0x1a   : > { %v640_v63 = vadd.f32 %v639_v57, %v630_v56  ;;  %v1094_v56 = vld [vmem:[%s1399_s7 + $0x15] ss:$0 sm:$0xff] }
  0x9f   : > { %v413_v3 = vpop.xlane.xlu0 %412 }
  0xa0   : > { %v415_v4 = vmul.f32 0.03125, %v413_v3  ;;  %v650_v3 = vadd.f32 %v649_v0, %v640_v63 }
  0xa2   : > { %v416_v5 = vsub.f32 %v409_v1, %v415_v4  ;;  %v653_v1 = vld [vmem:[#allocation2 + $0x8] sm:$0xff] }
  0xa3   : > { %v659_v4 = vmul.f32 %v1080_v2, %v653_v1  ;;  %v821_v1 = vld [vmem:[#allocation2 + $0x19] sm:$0xff]  ;;  %v1097_v2 = vld [vmem:[%s1399_s7 + $0x18] ss:$0 sm:$0xff] }
  0xa4   : > { %v417_v6 = vmul.f32 %v416_v5, %v416_v5 }
  0xa6   : > { %v418_v7 = vsel %vm410_vm1, %v417_v6, 0.0  ;;  %v660_v6 = vadd.f32 %v659_v4, %v650_v3 }
  0xa7   : > { %419 = vadd.xlane.f32.xlu0 %v418_v7 }
 0x134   : > { %v420_v12 = vpop.xlane.xlu0 %419 }
 0x135   : > { %v421_v13 = vmul.f32 0.03125, %v420_v12  ;;  %v1083_v12 = vld [vmem:[%s1399_s7 + $0xa] ss:$0 sm:$0xff] }
 0x137   : > { %v422_v14 = vadd.f32 1e-05, %v421_v13 }
 0x139   : > { %1143 = vrsqrt.f32 %v422_v14 }
 0x143   : > { %v1144_v15 = vpop.eup %1143 }
 0x144   : > { %v424_v17 = vmul.f32 %v1144_v15, %v416_v5  ;;  %v1081_v5 = vld [vmem:[%s1399_s7 + $0x8] ss:$0 sm:$0xff] }
 0x146   : > { %v432_v19 = vmul.f32 %v1062_v16, %v424_v17  ;;  %v1084_v16 = vld [vmem:[%s1399_s7 + $0xb] ss:$0 sm:$0xff] }
 0x148   : > { %v440_v20 = vadd.f32 %v1063_v18, %v432_v19 }
 0x14a   : > { %v441_v21 = vpack.c.bf16 %v440_v20, %v440_v20  ;;  %v1085_v20 = vld [vmem:[%s1399_s7 + $0xc] ss:$0 sm:$0xff] }
 0x14c   : > { %1118 = vmatmul.mubr.msk.bf16.vlgmr.msra.gmra.mrb[0].mxu0 %vm410_vm1, %v441_v21  ;;  %1126 = vmatmul.mubr.msk.bf16.vlgmr.msra.gmra.mrb[0].mxu1 %vm410_vm1, %v441_v21 }
 0x21f   : > { %v502_v23 = vpop.f32.mrb[0].mxu0  ;;  %v565_v24 = vpop.f32.mrb[0].mxu1 }
 0x220   : > { %v566_v25 = vadd.f32 %v1068_v22, %v565_v24  ;;  %v1119_v26 = vpop.f32.mrb[1].mxu0  ;;  %v1127_v27 = vpop.f32.mrb[1].mxu1  ;;  %v503_v60 = vadd.f32 %v1064_v55, %v502_v23  ;;  %v1086_v24 = vld [vmem:[%s1399_s7 + $0xd] ss:$0 sm:$0xff] }
 0x221   : > { %v505_v28 = vpop.f32.mrb[2].mxu0  ;;  %v568_v29 = vpop.f32.mrb[2].mxu1 }
 0x222   : > { %v1072_v30 = vmul.f32 -1.442695, %v566_v25  ;;  %v1120_v31 = vpop.f32.mrb[3].mxu0  ;;  %v1128_v32 = vpop.f32.mrb[3].mxu1  ;;  %v1087_v28 = vld [vmem:[%s1399_s7 + $0xe] ss:$0 sm:$0xff] }
 0x223   : > { %v1088_v32 = vld [vmem:[%s1399_s7 + $0xf] ss:$0 sm:$0xff] }
 0x224   : > { %1145 = vpow2.f32 %v1072_v30 }
 0x22e   : > { %v1146_v45 = vpop.eup %1145 }
 0x22f   : > { %v574_v46 = vadd.f32 1.0, %v1146_v45 }
 0x231   : > { %1147 = vrcp.f32 %v574_v46 }
 0x23b   : > { %v1148_v61 = vpop.eup %1147 }
 0x23c   : > { %v577_v62 = vmul.f32 %v1148_v61, %v503_v60  ;;  %v811_v61 = vld [vmem:[#allocation2 + $0x18] sm:$0xff] }
 0x23e   : > { %580 = vst.msk [vmem:[#allocation2 + $0x10] sm:$0xff] %vm400_vm3, %v577_v62  ;;  %v1096_v62 = vld [vmem:[%s1399_s7 + $0x17] ss:$0 sm:$0xff] }
 0x245   : > { %v663_v7 = vld [vmem:[#allocation2 + $0x9] sm:$0xff]  ;;  %v741_v35 = vld [vmem:[#allocation2 + $0x11] sm:$0xff] }
 0x246   : > { %v673_v8 = vld [vmem:[#allocation2 + $0xa] sm:$0xff]  ;;  %v669_v10 = vmul.f32 %v1081_v5, %v663_v7  ;;  %v751_v39 = vld [vmem:[#allocation2 + $0x12] sm:$0xff]  ;;  %v747_v42 = vmul.f32 %v1089_v36, %v741_v35  ;;  %v817_v5 = vmul.f32 %v1096_v62, %v811_v61 }
 0x247   : > { %v683_v11 = vld [vmem:[#allocation2 + $0xb] sm:$0xff]  ;;  %v679_v14 = vmul.f32 %v1082_v9, %v673_v8  ;;  %v761_v43 = vld [vmem:[#allocation2 + $0x13] sm:$0xff]  ;;  %v757_v46 = vmul.f32 %v1090_v40, %v751_v39  ;;  %v827_v9 = vmul.f32 %v1097_v2, %v821_v1 }
 0x248   : > { %v670_v13 = vadd.f32 %v669_v10, %v660_v6  ;;  %v693_v15 = vld [vmem:[#allocation2 + $0xc] sm:$0xff]  ;;  %v689_v18 = vmul.f32 %v1083_v12, %v683_v11  ;;  %v771_v47 = vld [vmem:[#allocation2 + $0x14] sm:$0xff]  ;;  %v767_v50 = vmul.f32 %v1091_v44, %v761_v43 }
 0x249   : > { %v703_v19 = vld [vmem:[#allocation2 + $0xd] sm:$0xff]  ;;  %v699_v22 = vmul.f32 %v1084_v16, %v693_v15  ;;  %v781_v51 = vld [vmem:[#allocation2 + $0x15] sm:$0xff]  ;;  %v777_v54 = vmul.f32 %v1092_v48, %v771_v47 }
 0x24a   : > { %v680_v17 = vadd.f32 %v679_v14, %v670_v13  ;;  %v713_v23 = vld [vmem:[#allocation2 + $0xe] sm:$0xff]  ;;  %v709_v26 = vmul.f32 %v1085_v20, %v703_v19  ;;  %v791_v55 = vld [vmem:[#allocation2 + $0x16] sm:$0xff]  ;;  %v787_v58 = vmul.f32 %v1093_v52, %v781_v51  ;;  %v910_v52 = vld [vmem:[%s1243_s28] sm:$0x1] }
 0x24b   : > { %v723_v27 = vld [vmem:[#allocation2 + $0xf] sm:$0xff]  ;;  %v719_v30 = vmul.f32 %v1086_v24, %v713_v23  ;;  %v801_v60 = vld [vmem:[#allocation2 + $0x17] sm:$0xff]  ;;  %v797_v0 = vmul.f32 %v1094_v56, %v791_v55 }
 0x24c   : > { %v690_v21 = vadd.f32 %v689_v18, %v680_v17  ;;  %v731_v31 = vld [vmem:[#allocation2 + $0x10] sm:$0xff]  ;;  %v729_v34 = vmul.f32 %v1087_v28, %v723_v27  ;;  %v807_v4 = vmul.f32 %v1095_v59, %v801_v60  ;;  %v831_v6 = vld [vmem:[#allocation2 + $0x1a] sm:$0xff]  ;;  %v1098_v7 = vld [vmem:[%s1399_s7 + $0x19] ss:$0 sm:$0xff] }
 0x24d   : > { %v737_v38 = vmul.f32 %v1088_v32, %v731_v31  ;;  %v841_v10 = vld [vmem:[#allocation2 + $0x1b] sm:$0xff]  ;;  %v1099_v11 = vld [vmem:[%s1399_s7 + $0x1a] ss:$0 sm:$0xff]  ;;  %v837_v13 = vmul.f32 %v1098_v7, %v831_v6 }
 0x24e   : > { %v700_v25 = vadd.f32 %v699_v22, %v690_v21  ;;  %v851_v14 = vld [vmem:[#allocation2 + $0x1c] sm:$0xff]  ;;  %v1100_v15 = vld [vmem:[%s1399_s7 + $0x1b] ss:$0 sm:$0xff]  ;;  %v847_v17 = vmul.f32 %v1099_v11, %v841_v10 }
 0x24f   : > { %v861_v18 = vld [vmem:[#allocation2 + $0x1d] sm:$0xff]  ;;  %v1101_v19 = vld [vmem:[%s1399_s7 + $0x1c] ss:$0 sm:$0xff]  ;;  %v857_v21 = vmul.f32 %v1100_v15, %v851_v14 }
 0x250   : > { %v710_v29 = vadd.f32 %v709_v26, %v700_v25  ;;  %v871_v22 = vld [vmem:[#allocation2 + $0x1e] sm:$0xff]  ;;  %v1102_v23 = vld [vmem:[%s1399_s7 + $0x1d] ss:$0 sm:$0xff]  ;;  %v867_v25 = vmul.f32 %v1101_v19, %v861_v18 }
 0x251   : > { %v881_v26 = vld [vmem:[#allocation2 + $0x1f] sm:$0xff]  ;;  %v1103_v27 = vld [vmem:[%s1399_s7 + $0x1e] ss:$0 sm:$0xff] }
 0x252   : > { %v720_v33 = vadd.f32 %v719_v30, %v710_v29  ;;  %v877_v29 = vmul.f32 %v1102_v23, %v871_v22  ;;  %v887_v31 = vmul.f32 %v1103_v27, %v881_v26 }
 0x254   : > { %v730_v37 = vadd.f32 %v729_v34, %v720_v33  ;;  %v1104_v33 = vld [vmem:[%s1400_s8] ss:$0 sm:$0xff] }
 0x256   : > { %v738_v41 = vadd.f32 %v737_v38, %v730_v37 }
 0x258   : > { %v748_v45 = vadd.f32 %v747_v42, %v738_v41 }
 0x25a   : > { %v758_v49 = vadd.f32 %v757_v46, %v748_v45 }
 0x25c   : > { %v768_v53 = vadd.f32 %v767_v50, %v758_v49  ;;  %v900_v49 = vld [vmem:[%s1237_s25] sm:$0x1] }
 0x25e   : > { %v778_v57 = vadd.f32 %v777_v54, %v768_v53 }
 0x260   : > { %v788_v63 = vadd.f32 %v787_v58, %v778_v57 }
 0x262   : > { %v798_v3 = vadd.f32 %v797_v0, %v788_v63 }
 0x264   : > { %v808_v8 = vadd.f32 %v807_v4, %v798_v3 }
 0x266   : > { %v818_v12 = vadd.f32 %v817_v5, %v808_v8 }
 0x268   : > { %v828_v16 = vadd.f32 %v827_v9, %v818_v12 }
 0x26a   : > { %v838_v20 = vadd.f32 %v837_v13, %v828_v16 }
 0x26c   : > { %v848_v24 = vadd.f32 %v847_v17, %v838_v20 }
 0x26e   : > { %v858_v28 = vadd.f32 %v857_v21, %v848_v24 }
 0x270   : > { %v868_v30 = vadd.f32 %v867_v25, %v858_v28 }
 0x272   : > { %v878_v32 = vadd.f32 %v877_v29, %v868_v30 }
 0x274   : > { %v888_v34 = vadd.f32 %v887_v31, %v878_v32 }
 0x276   : > { %v896_v35 = vadd.f32 %v1104_v33, %v888_v34 }
 0x278   : > { %v897_v36 = vpack.c.bf16 %v896_v35, %v896_v35  ;;  %v901_v37 = vsel %vm400_vm3, %v896_v35, 0.0  ;;  %v911_v38 = vmul.f32 %v896_v35, %v896_v35 }
 0x279   : > { %v902_v39 = vrot.slane %v901_v37, 4 }
 0x27a   : > { %899 = vst.msk [vmem:[%s392_s20] sm:$0xf] %vm898_vm5, %v897_v36  ;;  %v912_v40 = vsel %vm400_vm3, %v911_v38, 0.0 }
 0x27b   : > { %v903_v41 = vadd.f32 %v902_v39, %v901_v37  ;;  %v913_v42 = vrot.slane %v912_v40, 4 }
 0x27d   : > { %v904_v43 = vrot.slane %v903_v41, 2  ;;  %v914_v44 = vadd.f32 %v913_v42, %v912_v40 }
 0x27f   : > { %v905_v45 = vadd.f32 %v904_v43, %v903_v41  ;;  %v915_v46 = vrot.slane %v914_v44, 2 }
 0x281   : > { %v906_v47 = vrot.slane %v905_v45, 1  ;;  %v916_v48 = vadd.f32 %v915_v46, %v914_v44 }
 0x283   : > { %v907_v50 = vadd.f32 %v906_v47, %v905_v45  ;;  %v917_v51 = vrot.slane %v916_v48, 1 }
 0x285   : > { %v908_v53 = vadd.f32 %v907_v50, %v900_v49  ;;  %v918_v54 = vadd.f32 %v917_v51, %v916_v48 }
 0x287   : > { %909 = vst.msk [vmem:[%s1237_s25] sm:$0x1] %vm406_vm0, %v908_v53  ;;  %v919_v55 = vadd.f32 %v918_v54, %v910_v52 }
 0x289   : > { %920 = vst.msk [vmem:[%s1243_s28] sm:$0x1] %vm406_vm0, %v919_v55 }
 0x28a PF: > { %s22_s17 = sadd.s32 1, %s1155_s17  }
 0x28b   : > { %p19_p4 = scmp.ge.s32.totalorder %s22_s17, 4  }
 0x28d   :  { %21 = sbr.rel (!%p19_p4) target bundleno = 1 (0x1), region = 141 }

</bundles_post_ra>
